<compile_context>
chip_gen: v5e
topology: v5e:2x2
jax: 0.10.0
libtpu: 0.0.40
codegen_flags: <defaults>
</compile_context>

<pallas_src>
import functools

import jax
import jax.numpy as jnp
from jax import lax
from jax.experimental import pallas as pl
from jax.experimental.pallas import tpu as pltpu

EPS = 1e-6


# ---------------------------------------------------------------------------
# Fused PerceiverAttentionBlock kernel (one grid step per batch element)
# ---------------------------------------------------------------------------
def _perceiver_block_kernel(
    x_ref, lat_ref, temb_ref,
    wa1_ref, ba1_ref, wa2_ref, ba2_ref, waf_ref, baf_ref,
    wq_ref, bq_ref, wkv_ref, bkv_ref, wo_ref, bo_ref,
    wfc_ref, bfc_ref, wpj_ref, bpj_ref,
    o_ref, *, n_heads):
    D = lat_ref.shape[-1]
    Dh = D // n_heads
    inv_sqrt_dh = 1.0 / float(Dh) ** 0.5

    xin = x_ref[0].astype(jnp.float32)       # (Sx, D)
    lat = lat_ref[0].astype(jnp.float32)     # (Sl, D)
    temb = temb_ref[0].astype(jnp.float32)   # (1, T)

    # SiLU(t) computed once, shared by all three AdaLayerNorms.
    silu_t = temb / (1.0 + jnp.exp(-temb))   # (1, T)

    def adaln(inp, w_ref, b_ref):
        # (1, T) @ (T, 2D) -> [shift | scale]   (weights already (in, out))
        e = jnp.dot(silu_t, w_ref[...], preferred_element_type=jnp.float32) + b_ref[...]
        shift = e[:, :D]
        scale = e[:, D:]
        mean = jnp.mean(inp, axis=-1, keepdims=True)
        var = jnp.mean(jnp.square(inp - mean), axis=-1, keepdims=True)
        normed = (inp - mean) * lax.rsqrt(var + EPS)
        return normed * (1.0 + scale) + shift

    normed_lat = adaln(lat, wa1_ref, ba1_ref)     # (Sl, D)
    normed_x = adaln(xin, wa2_ref, ba2_ref)       # (Sx, D)

    # KV sequence concat stays in VMEM (no HBM round trip).
    kv_in = jnp.concatenate([normed_lat, normed_x], axis=0)    # (Skv, D)

    # Q for latents only; fused K|V projection: one (Skv, D) @ (D, 2D) matmul.
    q = jnp.dot(normed_lat, wq_ref[...], preferred_element_type=jnp.float32) + bq_ref[...]
    kv = jnp.dot(kv_in, wkv_ref[...], preferred_element_type=jnp.float32) + bkv_ref[...]
    k = kv[:, :D]
    v = kv[:, D:]
    q = q * inv_sqrt_dh          # fold 1/sqrt(Dh) once, over all heads

    # Per-head attention.  The head concat is eliminated by accumulating each
    # head's context directly into the output projection.  (At Dh=8, H=4 the
    # per-head dots are kept for robust lowering; at production d_model switch
    # to a head-batched 'qhd,khd->hqk' einsum.)
    attn = jnp.zeros((normed_lat.shape[0], D), jnp.float32)
    for h in range(n_heads):                      # static unroll
        cols = slice(h * Dh, (h + 1) * Dh)
        # q_h @ k_h^T without an explicit transpose (contract last dims).
        s = lax.dot_general(q[:, cols], k[:, cols],
                            dimension_numbers=(((1,), (1,)), ((), ())),
                            preferred_element_type=jnp.float32)      # (Sl, Skv)
        s = s - jnp.max(s, axis=-1, keepdims=True)
        p = jnp.exp(s)
        p = p * pl.reciprocal(jnp.sum(p, axis=-1, keepdims=True), approx=True)
        ctx = jnp.dot(p, v[:, cols], preferred_element_type=jnp.float32)  # (Sl, Dh)
        attn = attn + jnp.dot(ctx, wo_ref[cols, :],
                              preferred_element_type=jnp.float32)         # (Sl, D)
    attn = attn + bo_ref[...]

    lat = lat + attn                              # first residual

    # MLP: Linear(D, 4D) -> SquaredReLU -> Linear(4D, D) on AdaLN(latents).
    nff = adaln(lat, waf_ref, baf_ref)
    h1 = jnp.dot(nff, wfc_ref[...], preferred_element_type=jnp.float32) + bfc_ref[...]
    h1 = jnp.square(jnp.maximum(h1, 0.0))
    ff = jnp.dot(h1, wpj_ref[...], preferred_element_type=jnp.float32) + bpj_ref[...]

    # D=32 (< 128 lanes) keeps the module interface; after fusion this is the only
    # (small) masked store per batch element.
    o_ref[0] = (lat + ff).astype(o_ref.dtype)


# ---------------------------------------------------------------------------
# Wrapper: pre-transpose / pack weights once, launch the fused kernel
# ---------------------------------------------------------------------------
def perceiver_block_pallas(x, latents, t_emb, p, n_heads):
    B, Sx, D = x.shape
    Sl = latents.shape[1]
    T = t_emb.shape[-1]

    # One-time XLA ops: every weight becomes (in, out); K/V are fused.
    wa1, ba1 = p["ln1_w"].T, p["ln1_b"][None, :]
    wa2, ba2 = p["ln2_w"].T, p["ln2_b"][None, :]
    waf, baf = p["lnff_w"].T, p["lnff_b"][None, :]
    wq_, wk_, wv_ = jnp.split(p["in_proj_w"], 3, axis=0)
    bq_, bk_, bv_ = jnp.split(p["in_proj_b"], 3, axis=0)
    wq, bq = wq_.T, bq_[None, :]                                  # (D, D), (1, D)
    wkv = jnp.concatenate([wk_, wv_], axis=0).T                   # (D, 2D)  K|V fused
    bkv = jnp.concatenate([bk_, bv_], axis=0)[None, :]            # (1, 2D)
    wo, bo = p["out_proj_w"].T, p["out_proj_b"][None, :]
    wfc, bfc = p["fc_w"].T, p["fc_b"][None, :]
    wpj, bpj = p["proj_w"].T, p["proj_b"][None, :]

    temb3 = t_emb[:, None, :]                                     # (B, 1, T)

    kernel = functools.partial(_perceiver_block_kernel, n_heads=n_heads)

    def wspec(shape):
        nd = len(shape)
        # Constant across the grid -> fetched once.  (At production d_model also
        # mark these pl.Buffered(1) and tile the 4*D MLP hidden dim for v7x VMEM.)
        return pl.BlockSpec(shape, lambda b: (0,) * nd)

    return pl.pallas_call(
        kernel,
        out_shape=jax.ShapeDtypeStruct((B, Sl, D), latents.dtype),
        grid=(B,),
        in_specs=[
            pl.BlockSpec((1, Sx, D), lambda b: (b, 0, 0)),
            pl.BlockSpec((1, Sl, D), lambda b: (b, 0, 0)),
            pl.BlockSpec((1, 1, T), lambda b: (b, 0, 0)),
            wspec((T, 2 * D)), wspec((1, 2 * D)),
            wspec((T, 2 * D)), wspec((1, 2 * D)),
            wspec((T, 2 * D)), wspec((1, 2 * D)),
            wspec((D, D)), wspec((1, D)),
            wspec((D, 2 * D)), wspec((1, 2 * D)),
            wspec((D, D)), wspec((1, D)),
            wspec((D, 4 * D)), wspec((1, 4 * D)),
            wspec((4 * D, D)), wspec((1, D)),
        ],
        out_specs=pl.BlockSpec((1, Sl, D), lambda b: (b, 0, 0)),
        compiler_params=pltpu.CompilerParams(
            dimension_semantics=("parallel",)),   # v7x megacore: batch split across TCs
    )(x, latents, temb3,
      wa1, ba1, wa2, ba2, waf, baf,
      wq, bq, wkv, bkv, wo, bo,
      wfc, bfc, wpj, bpj)


# ---------------------------------------------------------------------------
# Pure-JAX reference (mirrors the PyTorch module) for verification
# ---------------------------------------------------------------------------
def _adaln_ref(x, t_emb, w, b):
    D = x.shape[-1]
    emb = jax.nn.silu(t_emb) @ w.T + b
    shift = emb[:, None, :D]
    scale = emb[:, None, D:]
    mean = jnp.mean(x, axis=-1, keepdims=True)
    var = jnp.mean(jnp.square(x - mean), axis=-1, keepdims=True)
    normed = (x - mean) / jnp.sqrt(var + EPS)
    return normed * (1.0 + scale) + shift


def _mha_ref(q, kv, wq, wk, wv, wo, bq, bk, bv, bo, n_heads):
    B, Sq, D = q.shape
    Skv = kv.shape[1]
    Dh = D // n_heads
    Q = (q @ wq.T + bq).reshape(B, Sq, n_heads, Dh).transpose(0, 2, 1, 3)
    K = (kv @ wk.T + bk).reshape(B, Skv, n_heads, Dh).transpose(0, 2, 1, 3)
    V = (kv @ wv.T + bv).reshape(B, Skv, n_heads, Dh).transpose(0, 2, 1, 3)
    s = jnp.einsum("bhqd,bhkd->bhqk", Q, K) / jnp.sqrt(jnp.float32(Dh))
    pmat = jax.nn.softmax(s, axis=-1)
    ctx = jnp.einsum("bhqk,bhkd->bhqd", pmat, V)
    ctx = ctx.transpose(0, 2, 1, 3).reshape(B, Sq, D)
    return ctx @ wo.T + bo


def perceiver_block_ref(x, latents, t_emb, p, n_heads):
    normed_latents = _adaln_ref(latents, t_emb, p["ln1_w"], p["ln1_b"])
    normed_x = _adaln_ref(x, t_emb, p["ln2_w"], p["ln2_b"])
    kv = jnp.concatenate([normed_latents, normed_x], axis=1)
    wq, wk, wv = jnp.split(p["in_proj_w"], 3, axis=0)
    bq, bk, bv = jnp.split(p["in_proj_b"], 3, axis=0)
    latents = latents + _mha_ref(normed_latents, kv, wq, wk, wv,
                                 p["out_proj_w"], bq, bk, bv, p["out_proj_b"], n_heads)
    normed_ff = _adaln_ref(latents, t_emb, p["lnff_w"], p["lnff_b"])
    h = normed_ff @ p["fc_w"].T + p["fc_b"]
    h = jnp.square(jnp.maximum(h, 0.0))
    ff = h @ p["proj_w"].T + p["proj_b"]
    return latents + ff


# ---------------------------------------------------------------------------
if __name__ == "__main__":
    B, S_x, S_lat = 2, 16, 8
    d_model, n_heads, time_dim = 32, 4, 32

    key = jax.random.PRNGKey(0)
    ks = jax.random.split(key, 20)

    def nrm(k, shape, s=0.05):
        return (s * jax.random.normal(k, shape)).astype(jnp.float32)

    # NOTE: the PyTorch module zero-inits the AdaLayerNorm linear layers; we use
    # small deterministic random weights here so the scale/shift path is exercised.
    params = {
        "ln1_w":  nrm(ks[0], (2 * d_model, time_dim)),
        "ln1_b":  nrm(ks[1], (2 * d_model,)),
        "ln2_w":  nrm(ks[2], (2 * d_model, time_dim)),
        "ln2_b":  nrm(ks[3], (2 * d_model,)),
        "lnff_w": nrm(ks[4], (2 * d_model, time_dim)),
        "lnff_b": nrm(ks[5], (2 * d_model,)),
        "in_proj_w":  nrm(ks[6], (3 * d_model, d_model)),
        "in_proj_b":  nrm(ks[7], (3 * d_model,)),
        "out_proj_w": nrm(ks[8], (d_model, d_model)),
        "out_proj_b": nrm(ks[9], (d_model,)),
        "fc_w":   nrm(ks[10], (4 * d_model, d_model)),
        "fc_b":   nrm(ks[11], (4 * d_model,)),
        "proj_w": nrm(ks[12], (d_model, 4 * d_model)),
        "proj_b": nrm(ks[13], (d_model,)),
    }

    x = jax.random.normal(ks[14], (B, S_x, d_model), dtype=jnp.float32)
    latents = jax.random.normal(ks[15], (B, S_lat, d_model), dtype=jnp.float32)
    t_emb = jax.random.normal(ks[16], (B, time_dim), dtype=jnp.float32)

    fwd = jax.jit(perceiver_block_pallas, static_argnames=("n_heads",))
    out = jax.block_until_ready(fwd(x, latents, t_emb, params, n_heads=n_heads))

    ref = perceiver_block_ref(x, latents, t_emb, params, n_heads)
    if not bool(jnp.allclose(out, ref, atol=1e-3, rtol=1e-2)):
        max_err = float(jnp.max(jnp.abs(out - ref)))
        raise RuntimeError(f"Pallas output mismatch vs reference, max abs err {max_err}")

    print("KERNEL_OK")
</pallas_src>

<mosaic_0001>
module attributes {stable_mosaic.version = 11 : i64} {
  func.func @_perceiver_block_kernel(%arg0: i32, %arg1: memref<1x16x32xf32, #tpu.memory_space<vmem>>, %arg2: memref<1x8x32xf32, #tpu.memory_space<vmem>>, %arg3: memref<1x1x32xf32, #tpu.memory_space<vmem>>, %arg4: memref<32x64xf32, #tpu.memory_space<vmem>>, %arg5: memref<1x64xf32, #tpu.memory_space<vmem>>, %arg6: memref<32x64xf32, #tpu.memory_space<vmem>>, %arg7: memref<1x64xf32, #tpu.memory_space<vmem>>, %arg8: memref<32x64xf32, #tpu.memory_space<vmem>>, %arg9: memref<1x64xf32, #tpu.memory_space<vmem>>, %arg10: memref<32x32xf32, #tpu.memory_space<vmem>>, %arg11: memref<1x32xf32, #tpu.memory_space<vmem>>, %arg12: memref<32x64xf32, #tpu.memory_space<vmem>>, %arg13: memref<1x64xf32, #tpu.memory_space<vmem>>, %arg14: memref<32x32xf32, #tpu.memory_space<vmem>>, %arg15: memref<1x32xf32, #tpu.memory_space<vmem>>, %arg16: memref<32x128xf32, #tpu.memory_space<vmem>>, %arg17: memref<1x128xf32, #tpu.memory_space<vmem>>, %arg18: memref<128x32xf32, #tpu.memory_space<vmem>>, %arg19: memref<1x32xf32, #tpu.memory_space<vmem>>, %arg20: memref<1x8x32xf32, #tpu.memory_space<vmem>>) attributes {dimension_semantics = [#tpu.dimension_semantics<parallel>], iteration_bounds = array<i64: 2>, scalar_prefetch = 0 : i64, scratch_operands = 0 : i64, tpu.core_type = #tpu.core_type<tc>, window_params = [{transform_indices = @transform_0, window_bounds = array<i64: 1, 16, 32>}, {transform_indices = @transform_1, window_bounds = array<i64: 1, 8, 32>}, {transform_indices = @transform_2, window_bounds = array<i64: 1, 1, 32>}, {pipeline_mode = #tpu.pipeline_mode<synchronous>, transform_indices = @transform_3, window_bounds = array<i64: 32, 64>}, {pipeline_mode = #tpu.pipeline_mode<synchronous>, transform_indices = @transform_4, window_bounds = array<i64: 1, 64>}, {pipeline_mode = #tpu.pipeline_mode<synchronous>, transform_indices = @transform_5, window_bounds = array<i64: 32, 64>}, {pipeline_mode = #tpu.pipeline_mode<synchronous>, transform_indices = @transform_6, window_bounds = array<i64: 1, 64>}, {pipeline_mode = #tpu.pipeline_mode<synchronous>, transform_indices = @transform_7, window_bounds = array<i64: 32, 64>}, {pipeline_mode = #tpu.pipeline_mode<synchronous>, transform_indices = @transform_8, window_bounds = array<i64: 1, 64>}, {pipeline_mode = #tpu.pipeline_mode<synchronous>, transform_indices = @transform_9, window_bounds = array<i64: 32, 32>}, {pipeline_mode = #tpu.pipeline_mode<synchronous>, transform_indices = @transform_10, window_bounds = array<i64: 1, 32>}, {pipeline_mode = #tpu.pipeline_mode<synchronous>, transform_indices = @transform_11, window_bounds = array<i64: 32, 64>}, {pipeline_mode = #tpu.pipeline_mode<synchronous>, transform_indices = @transform_12, window_bounds = array<i64: 1, 64>}, {pipeline_mode = #tpu.pipeline_mode<synchronous>, transform_indices = @transform_13, window_bounds = array<i64: 32, 32>}, {pipeline_mode = #tpu.pipeline_mode<synchronous>, transform_indices = @transform_14, window_bounds = array<i64: 1, 32>}, {pipeline_mode = #tpu.pipeline_mode<synchronous>, transform_indices = @transform_15, window_bounds = array<i64: 32, 128>}, {pipeline_mode = #tpu.pipeline_mode<synchronous>, transform_indices = @transform_16, window_bounds = array<i64: 1, 128>}, {pipeline_mode = #tpu.pipeline_mode<synchronous>, transform_indices = @transform_17, window_bounds = array<i64: 128, 32>}, {pipeline_mode = #tpu.pipeline_mode<synchronous>, transform_indices = @transform_18, window_bounds = array<i64: 1, 32>}, {transform_indices = @transform_19, window_bounds = array<i64: 1, 8, 32>}]} {
    %c0 = arith.constant 0 : index
    %c0_0 = arith.constant 0 : index
    %c0_1 = arith.constant 0 : index
    %0 = vector.load %arg1[%c0, %c0_0, %c0_1] : memref<1x16x32xf32, #tpu.memory_space<vmem>>, vector<1x16x32xf32>
    %1 = vector.shape_cast %0 : vector<1x16x32xf32> to vector<16x32xf32>
    %c0_2 = arith.constant 0 : index
    %c0_3 = arith.constant 0 : index
    %c0_4 = arith.constant 0 : index
    %2 = vector.load %arg2[%c0_2, %c0_3, %c0_4] : memref<1x8x32xf32, #tpu.memory_space<vmem>>, vector<1x8x32xf32>
    %3 = vector.shape_cast %2 : vector<1x8x32xf32> to vector<8x32xf32>
    %c0_5 = arith.constant 0 : index
    %c0_6 = arith.constant 0 : index
    %c0_7 = arith.constant 0 : index
    %4 = vector.load %arg3[%c0_5, %c0_6, %c0_7] : memref<1x1x32xf32, #tpu.memory_space<vmem>>, vector<1x1x32xf32>
    %5 = vector.shape_cast %4 : vector<1x1x32xf32> to vector<1x32xf32>
    %cst = arith.constant 0.000000e+00 : f32
    %6 = vector.broadcast %cst : f32 to vector<1x32xf32>
    %7 = arith.subf %6, %5 : vector<1x32xf32>
    %8 = math.exp %7 : vector<1x32xf32>
    %cst_8 = arith.constant 1.000000e+00 : f32
    %9 = vector.broadcast %cst_8 : f32 to vector<1x32xf32>
    %10 = arith.addf %9, %8 : vector<1x32xf32>
    %11 = arith.divf %5, %10 : vector<1x32xf32>
    %c0_9 = arith.constant 0 : index
    %c0_10 = arith.constant 0 : index
    %12 = vector.load %arg4[%c0_9, %c0_10] : memref<32x64xf32, #tpu.memory_space<vmem>>, vector<32x64xf32>
    %cst_11 = arith.constant dense<0.000000e+00> : vector<1x64xf32>
    %13 = tpu.matmul %11, %12, %cst_11 {dimension_numbers = #tpu.dot_dimension_numbers<[1], [0], [0], [1], [0, 0, 1, 1], [], []>} : vector<1x32xf32>, vector<32x64xf32>, vector<1x64xf32> -> vector<1x64xf32>
    %c0_12 = arith.constant 0 : index
    %c0_13 = arith.constant 0 : index
    %14 = vector.load %arg5[%c0_12, %c0_13] : memref<1x64xf32, #tpu.memory_space<vmem>>, vector<1x64xf32>
    %15 = arith.addf %13, %14 : vector<1x64xf32>
    %16 = vector.extract_strided_slice %15 {offsets = [0, 0], sizes = [1, 32], strides = [1, 1]} : vector<1x64xf32> to vector<1x32xf32>
    %17 = vector.extract_strided_slice %15 {offsets = [0, 32], sizes = [1, 32], strides = [1, 1]} : vector<1x64xf32> to vector<1x32xf32>
    %cst_14 = arith.constant dense<0.000000e+00> : vector<8xf32>
    %18 = vector.multi_reduction <add>, %3, %cst_14 [1] : vector<8x32xf32> to vector<8xf32>
    %19 = vector.shape_cast %18 : vector<8xf32> to vector<8x1xf32>
    %cst_15 = arith.constant 3.200000e+01 : f32
    %20 = vector.broadcast %cst_15 : f32 to vector<8x1xf32>
    %21 = arith.divf %19, %20 : vector<8x1xf32>
    %22 = vector.broadcast %21 : vector<8x1xf32> to vector<8x32xf32>
    %23 = arith.subf %3, %22 : vector<8x32xf32>
    %24 = arith.mulf %23, %23 : vector<8x32xf32>
    %cst_16 = arith.constant dense<0.000000e+00> : vector<8xf32>
    %25 = vector.multi_reduction <add>, %24, %cst_16 [1] : vector<8x32xf32> to vector<8xf32>
    %26 = vector.shape_cast %25 : vector<8xf32> to vector<8x1xf32>
    %cst_17 = arith.constant 3.200000e+01 : f32
    %27 = vector.broadcast %cst_17 : f32 to vector<8x1xf32>
    %28 = arith.divf %26, %27 : vector<8x1xf32>
    %29 = vector.broadcast %21 : vector<8x1xf32> to vector<8x32xf32>
    %30 = arith.subf %3, %29 : vector<8x32xf32>
    %cst_18 = arith.constant 9.99999997E-7 : f32
    %31 = vector.broadcast %cst_18 : f32 to vector<8x1xf32>
    %32 = arith.addf %28, %31 : vector<8x1xf32>
    %33 = math.rsqrt %32 : vector<8x1xf32>
    %34 = vector.broadcast %33 : vector<8x1xf32> to vector<8x32xf32>
    %35 = arith.mulf %30, %34 : vector<8x32xf32>
    %cst_19 = arith.constant 1.000000e+00 : f32
    %36 = vector.broadcast %cst_19 : f32 to vector<1x32xf32>
    %37 = arith.addf %36, %17 : vector<1x32xf32>
    %38 = vector.broadcast %37 : vector<1x32xf32> to vector<8x32xf32>
    %39 = arith.mulf %35, %38 : vector<8x32xf32>
    %40 = vector.broadcast %16 : vector<1x32xf32> to vector<8x32xf32>
    %41 = arith.addf %39, %40 : vector<8x32xf32>
    %c0_20 = arith.constant 0 : index
    %c0_21 = arith.constant 0 : index
    %42 = vector.load %arg6[%c0_20, %c0_21] : memref<32x64xf32, #tpu.memory_space<vmem>>, vector<32x64xf32>
    %cst_22 = arith.constant dense<0.000000e+00> : vector<1x64xf32>
    %43 = tpu.matmul %11, %42, %cst_22 {dimension_numbers = #tpu.dot_dimension_numbers<[1], [0], [0], [1], [0, 0, 1, 1], [], []>} : vector<1x32xf32>, vector<32x64xf32>, vector<1x64xf32> -> vector<1x64xf32>
    %c0_23 = arith.constant 0 : index
    %c0_24 = arith.constant 0 : index
    %44 = vector.load %arg7[%c0_23, %c0_24] : memref<1x64xf32, #tpu.memory_space<vmem>>, vector<1x64xf32>
    %45 = arith.addf %43, %44 : vector<1x64xf32>
    %46 = vector.extract_strided_slice %45 {offsets = [0, 0], sizes = [1, 32], strides = [1, 1]} : vector<1x64xf32> to vector<1x32xf32>
    %47 = vector.extract_strided_slice %45 {offsets = [0, 32], sizes = [1, 32], strides = [1, 1]} : vector<1x64xf32> to vector<1x32xf32>
    %cst_25 = arith.constant dense<0.000000e+00> : vector<16xf32>
    %48 = vector.multi_reduction <add>, %1, %cst_25 [1] : vector<16x32xf32> to vector<16xf32>
    %49 = vector.shape_cast %48 : vector<16xf32> to vector<16x1xf32>
    %cst_26 = arith.constant 3.200000e+01 : f32
    %50 = vector.broadcast %cst_26 : f32 to vector<16x1xf32>
    %51 = arith.divf %49, %50 : vector<16x1xf32>
    %52 = vector.broadcast %51 : vector<16x1xf32> to vector<16x32xf32>
    %53 = arith.subf %1, %52 : vector<16x32xf32>
    %54 = arith.mulf %53, %53 : vector<16x32xf32>
    %cst_27 = arith.constant dense<0.000000e+00> : vector<16xf32>
    %55 = vector.multi_reduction <add>, %54, %cst_27 [1] : vector<16x32xf32> to vector<16xf32>
    %56 = vector.shape_cast %55 : vector<16xf32> to vector<16x1xf32>
    %cst_28 = arith.constant 3.200000e+01 : f32
    %57 = vector.broadcast %cst_28 : f32 to vector<16x1xf32>
    %58 = arith.divf %56, %57 : vector<16x1xf32>
    %59 = vector.broadcast %51 : vector<16x1xf32> to vector<16x32xf32>
    %60 = arith.subf %1, %59 : vector<16x32xf32>
    %cst_29 = arith.constant 9.99999997E-7 : f32
    %61 = vector.broadcast %cst_29 : f32 to vector<16x1xf32>
    %62 = arith.addf %58, %61 : vector<16x1xf32>
    %63 = math.rsqrt %62 : vector<16x1xf32>
    %64 = vector.broadcast %63 : vector<16x1xf32> to vector<16x32xf32>
    %65 = arith.mulf %60, %64 : vector<16x32xf32>
    %cst_30 = arith.constant 1.000000e+00 : f32
    %66 = vector.broadcast %cst_30 : f32 to vector<1x32xf32>
    %67 = arith.addf %66, %47 : vector<1x32xf32>
    %68 = vector.broadcast %67 : vector<1x32xf32> to vector<16x32xf32>
    %69 = arith.mulf %65, %68 : vector<16x32xf32>
    %70 = vector.broadcast %46 : vector<1x32xf32> to vector<16x32xf32>
    %71 = arith.addf %69, %70 : vector<16x32xf32>
    %72 = tpu.concatenate %41, %71 in 0 : vector<8x32xf32>, vector<16x32xf32> -> vector<24x32xf32>
    %c0_31 = arith.constant 0 : index
    %c0_32 = arith.constant 0 : index
    %73 = vector.load %arg10[%c0_31, %c0_32] : memref<32x32xf32, #tpu.memory_space<vmem>>, vector<32x32xf32>
    %cst_33 = arith.constant dense<0.000000e+00> : vector<8x32xf32>
    %74 = tpu.matmul %41, %73, %cst_33 {dimension_numbers = #tpu.dot_dimension_numbers<[1], [0], [0], [1], [0, 0, 1, 1], [], []>} : vector<8x32xf32>, vector<32x32xf32>, vector<8x32xf32> -> vector<8x32xf32>
    %c0_34 = arith.constant 0 : index
    %c0_35 = arith.constant 0 : index
    %75 = vector.load %arg11[%c0_34, %c0_35] : memref<1x32xf32, #tpu.memory_space<vmem>>, vector<1x32xf32>
    %76 = vector.broadcast %75 : vector<1x32xf32> to vector<8x32xf32>
    %77 = arith.addf %74, %76 : vector<8x32xf32>
    %c0_36 = arith.constant 0 : index
    %c0_37 = arith.constant 0 : index
    %78 = vector.load %arg12[%c0_36, %c0_37] : memref<32x64xf32, #tpu.memory_space<vmem>>, vector<32x64xf32>
    %cst_38 = arith.constant dense<0.000000e+00> : vector<24x64xf32>
    %79 = tpu.matmul %72, %78, %cst_38 {dimension_numbers = #tpu.dot_dimension_numbers<[1], [0], [0], [1], [0, 0, 1, 1], [], []>} : vector<24x32xf32>, vector<32x64xf32>, vector<24x64xf32> -> vector<24x64xf32>
    %c0_39 = arith.constant 0 : index
    %c0_40 = arith.constant 0 : index
    %80 = vector.load %arg13[%c0_39, %c0_40] : memref<1x64xf32, #tpu.memory_space<vmem>>, vector<1x64xf32>
    %81 = vector.broadcast %80 : vector<1x64xf32> to vector<24x64xf32>
    %82 = arith.addf %79, %81 : vector<24x64xf32>
    %83 = vector.extract_strided_slice %82 {offsets = [0, 0], sizes = [24, 32], strides = [1, 1]} : vector<24x64xf32> to vector<24x32xf32>
    %84 = vector.extract_strided_slice %82 {offsets = [0, 32], sizes = [24, 32], strides = [1, 1]} : vector<24x64xf32> to vector<24x32xf32>
    %cst_41 = arith.constant 0.353553385 : f32
    %85 = vector.broadcast %cst_41 : f32 to vector<8x32xf32>
    %86 = arith.mulf %77, %85 : vector<8x32xf32>
    %cst_42 = arith.constant 0.000000e+00 : f32
    %87 = vector.broadcast %cst_42 : f32 to vector<8x32xf32>
    %88 = vector.extract_strided_slice %86 {offsets = [0, 0], sizes = [8, 8], strides = [1, 1]} : vector<8x32xf32> to vector<8x8xf32>
    %89 = vector.extract_strided_slice %83 {offsets = [0, 0], sizes = [24, 8], strides = [1, 1]} : vector<24x32xf32> to vector<24x8xf32>
    %cst_43 = arith.constant dense<0.000000e+00> : vector<8x24xf32>
    %90 = tpu.matmul %88, %89, %cst_43 {dimension_numbers = #tpu.dot_dimension_numbers<[1], [1], [0], [0], [0, 0, 1, 0], [], []>} : vector<8x8xf32>, vector<24x8xf32>, vector<8x24xf32> -> vector<8x24xf32>
    %cst_44 = arith.constant dense<0xFF800000> : vector<8xf32>
    %91 = vector.multi_reduction <maximumf>, %90, %cst_44 [1] : vector<8x24xf32> to vector<8xf32>
    %92 = vector.shape_cast %91 : vector<8xf32> to vector<8x1xf32>
    %93 = vector.broadcast %92 : vector<8x1xf32> to vector<8x24xf32>
    %94 = arith.subf %90, %93 : vector<8x24xf32>
    %95 = math.exp %94 : vector<8x24xf32>
    %cst_45 = arith.constant dense<0.000000e+00> : vector<8xf32>
    %96 = vector.multi_reduction <add>, %95, %cst_45 [1] : vector<8x24xf32> to vector<8xf32>
    %97 = vector.shape_cast %96 : vector<8xf32> to vector<8x1xf32>
    %98 = tpu.reciprocal %97 {approx = true} : vector<8x1xf32> -> vector<8x1xf32>
    %99 = vector.broadcast %98 : vector<8x1xf32> to vector<8x24xf32>
    %100 = arith.mulf %95, %99 : vector<8x24xf32>
    %101 = vector.extract_strided_slice %84 {offsets = [0, 0], sizes = [24, 8], strides = [1, 1]} : vector<24x32xf32> to vector<24x8xf32>
    %cst_46 = arith.constant dense<0.000000e+00> : vector<8x8xf32>
    %102 = tpu.matmul %100, %101, %cst_46 {dimension_numbers = #tpu.dot_dimension_numbers<[1], [0], [0], [1], [0, 0, 1, 1], [], []>} : vector<8x24xf32>, vector<24x8xf32>, vector<8x8xf32> -> vector<8x8xf32>
    %c0_47 = arith.constant 0 : index
    %c0_48 = arith.constant 0 : index
    %103 = vector.load %arg14[%c0_47, %c0_48] : memref<32x32xf32, #tpu.memory_space<vmem>>, vector<8x32xf32>
    %cst_49 = arith.constant dense<0.000000e+00> : vector<8x32xf32>
    %104 = tpu.matmul %102, %103, %cst_49 {dimension_numbers = #tpu.dot_dimension_numbers<[1], [0], [0], [1], [0, 0, 1, 1], [], []>} : vector<8x8xf32>, vector<8x32xf32>, vector<8x32xf32> -> vector<8x32xf32>
    %105 = arith.addf %87, %104 : vector<8x32xf32>
    %106 = vector.extract_strided_slice %86 {offsets = [0, 8], sizes = [8, 8], strides = [1, 1]} : vector<8x32xf32> to vector<8x8xf32>
    %107 = vector.extract_strided_slice %83 {offsets = [0, 8], sizes = [24, 8], strides = [1, 1]} : vector<24x32xf32> to vector<24x8xf32>
    %cst_50 = arith.constant dense<0.000000e+00> : vector<8x24xf32>
    %108 = tpu.matmul %106, %107, %cst_50 {dimension_numbers = #tpu.dot_dimension_numbers<[1], [1], [0], [0], [0, 0, 1, 0], [], []>} : vector<8x8xf32>, vector<24x8xf32>, vector<8x24xf32> -> vector<8x24xf32>
    %cst_51 = arith.constant dense<0xFF800000> : vector<8xf32>
    %109 = vector.multi_reduction <maximumf>, %108, %cst_51 [1] : vector<8x24xf32> to vector<8xf32>
    %110 = vector.shape_cast %109 : vector<8xf32> to vector<8x1xf32>
    %111 = vector.broadcast %110 : vector<8x1xf32> to vector<8x24xf32>
    %112 = arith.subf %108, %111 : vector<8x24xf32>
    %113 = math.exp %112 : vector<8x24xf32>
    %cst_52 = arith.constant dense<0.000000e+00> : vector<8xf32>
    %114 = vector.multi_reduction <add>, %113, %cst_52 [1] : vector<8x24xf32> to vector<8xf32>
    %115 = vector.shape_cast %114 : vector<8xf32> to vector<8x1xf32>
    %116 = tpu.reciprocal %115 {approx = true} : vector<8x1xf32> -> vector<8x1xf32>
    %117 = vector.broadcast %116 : vector<8x1xf32> to vector<8x24xf32>
    %118 = arith.mulf %113, %117 : vector<8x24xf32>
    %119 = vector.extract_strided_slice %84 {offsets = [0, 8], sizes = [24, 8], strides = [1, 1]} : vector<24x32xf32> to vector<24x8xf32>
    %cst_53 = arith.constant dense<0.000000e+00> : vector<8x8xf32>
    %120 = tpu.matmul %118, %119, %cst_53 {dimension_numbers = #tpu.dot_dimension_numbers<[1], [0], [0], [1], [0, 0, 1, 1], [], []>} : vector<8x24xf32>, vector<24x8xf32>, vector<8x8xf32> -> vector<8x8xf32>
    %c8 = arith.constant 8 : index
    %c0_54 = arith.constant 0 : index
    %121 = vector.load %arg14[%c8, %c0_54] : memref<32x32xf32, #tpu.memory_space<vmem>>, vector<8x32xf32>
    %cst_55 = arith.constant dense<0.000000e+00> : vector<8x32xf32>
    %122 = tpu.matmul %120, %121, %cst_55 {dimension_numbers = #tpu.dot_dimension_numbers<[1], [0], [0], [1], [0, 0, 1, 1], [], []>} : vector<8x8xf32>, vector<8x32xf32>, vector<8x32xf32> -> vector<8x32xf32>
    %123 = arith.addf %105, %122 : vector<8x32xf32>
    %124 = vector.extract_strided_slice %86 {offsets = [0, 16], sizes = [8, 8], strides = [1, 1]} : vector<8x32xf32> to vector<8x8xf32>
    %125 = vector.extract_strided_slice %83 {offsets = [0, 16], sizes = [24, 8], strides = [1, 1]} : vector<24x32xf32> to vector<24x8xf32>
    %cst_56 = arith.constant dense<0.000000e+00> : vector<8x24xf32>
    %126 = tpu.matmul %124, %125, %cst_56 {dimension_numbers = #tpu.dot_dimension_numbers<[1], [1], [0], [0], [0, 0, 1, 0], [], []>} : vector<8x8xf32>, vector<24x8xf32>, vector<8x24xf32> -> vector<8x24xf32>
    %cst_57 = arith.constant dense<0xFF800000> : vector<8xf32>
    %127 = vector.multi_reduction <maximumf>, %126, %cst_57 [1] : vector<8x24xf32> to vector<8xf32>
    %128 = vector.shape_cast %127 : vector<8xf32> to vector<8x1xf32>
    %129 = vector.broadcast %128 : vector<8x1xf32> to vector<8x24xf32>
    %130 = arith.subf %126, %129 : vector<8x24xf32>
    %131 = math.exp %130 : vector<8x24xf32>
    %cst_58 = arith.constant dense<0.000000e+00> : vector<8xf32>
    %132 = vector.multi_reduction <add>, %131, %cst_58 [1] : vector<8x24xf32> to vector<8xf32>
    %133 = vector.shape_cast %132 : vector<8xf32> to vector<8x1xf32>
    %134 = tpu.reciprocal %133 {approx = true} : vector<8x1xf32> -> vector<8x1xf32>
    %135 = vector.broadcast %134 : vector<8x1xf32> to vector<8x24xf32>
    %136 = arith.mulf %131, %135 : vector<8x24xf32>
    %137 = vector.extract_strided_slice %84 {offsets = [0, 16], sizes = [24, 8], strides = [1, 1]} : vector<24x32xf32> to vector<24x8xf32>
    %cst_59 = arith.constant dense<0.000000e+00> : vector<8x8xf32>
    %138 = tpu.matmul %136, %137, %cst_59 {dimension_numbers = #tpu.dot_dimension_numbers<[1], [0], [0], [1], [0, 0, 1, 1], [], []>} : vector<8x24xf32>, vector<24x8xf32>, vector<8x8xf32> -> vector<8x8xf32>
    %c16 = arith.constant 16 : index
    %c0_60 = arith.constant 0 : index
    %139 = vector.load %arg14[%c16, %c0_60] : memref<32x32xf32, #tpu.memory_space<vmem>>, vector<8x32xf32>
    %cst_61 = arith.constant dense<0.000000e+00> : vector<8x32xf32>
    %140 = tpu.matmul %138, %139, %cst_61 {dimension_numbers = #tpu.dot_dimension_numbers<[1], [0], [0], [1], [0, 0, 1, 1], [], []>} : vector<8x8xf32>, vector<8x32xf32>, vector<8x32xf32> -> vector<8x32xf32>
    %141 = arith.addf %123, %140 : vector<8x32xf32>
    %142 = vector.extract_strided_slice %86 {offsets = [0, 24], sizes = [8, 8], strides = [1, 1]} : vector<8x32xf32> to vector<8x8xf32>
    %143 = vector.extract_strided_slice %83 {offsets = [0, 24], sizes = [24, 8], strides = [1, 1]} : vector<24x32xf32> to vector<24x8xf32>
    %cst_62 = arith.constant dense<0.000000e+00> : vector<8x24xf32>
    %144 = tpu.matmul %142, %143, %cst_62 {dimension_numbers = #tpu.dot_dimension_numbers<[1], [1], [0], [0], [0, 0, 1, 0], [], []>} : vector<8x8xf32>, vector<24x8xf32>, vector<8x24xf32> -> vector<8x24xf32>
    %cst_63 = arith.constant dense<0xFF800000> : vector<8xf32>
    %145 = vector.multi_reduction <maximumf>, %144, %cst_63 [1] : vector<8x24xf32> to vector<8xf32>
    %146 = vector.shape_cast %145 : vector<8xf32> to vector<8x1xf32>
    %147 = vector.broadcast %146 : vector<8x1xf32> to vector<8x24xf32>
    %148 = arith.subf %144, %147 : vector<8x24xf32>
    %149 = math.exp %148 : vector<8x24xf32>
    %cst_64 = arith.constant dense<0.000000e+00> : vector<8xf32>
    %150 = vector.multi_reduction <add>, %149, %cst_64 [1] : vector<8x24xf32> to vector<8xf32>
    %151 = vector.shape_cast %150 : vector<8xf32> to vector<8x1xf32>
    %152 = tpu.reciprocal %151 {approx = true} : vector<8x1xf32> -> vector<8x1xf32>
    %153 = vector.broadcast %152 : vector<8x1xf32> to vector<8x24xf32>
    %154 = arith.mulf %149, %153 : vector<8x24xf32>
    %155 = vector.extract_strided_slice %84 {offsets = [0, 24], sizes = [24, 8], strides = [1, 1]} : vector<24x32xf32> to vector<24x8xf32>
    %cst_65 = arith.constant dense<0.000000e+00> : vector<8x8xf32>
    %156 = tpu.matmul %154, %155, %cst_65 {dimension_numbers = #tpu.dot_dimension_numbers<[1], [0], [0], [1], [0, 0, 1, 1], [], []>} : vector<8x24xf32>, vector<24x8xf32>, vector<8x8xf32> -> vector<8x8xf32>
    %c24 = arith.constant 24 : index
    %c0_66 = arith.constant 0 : index
    %157 = vector.load %arg14[%c24, %c0_66] : memref<32x32xf32, #tpu.memory_space<vmem>>, vector<8x32xf32>
    %cst_67 = arith.constant dense<0.000000e+00> : vector<8x32xf32>
    %158 = tpu.matmul %156, %157, %cst_67 {dimension_numbers = #tpu.dot_dimension_numbers<[1], [0], [0], [1], [0, 0, 1, 1], [], []>} : vector<8x8xf32>, vector<8x32xf32>, vector<8x32xf32> -> vector<8x32xf32>
    %159 = arith.addf %141, %158 : vector<8x32xf32>
    %c0_68 = arith.constant 0 : index
    %c0_69 = arith.constant 0 : index
    %160 = vector.load %arg15[%c0_68, %c0_69] : memref<1x32xf32, #tpu.memory_space<vmem>>, vector<1x32xf32>
    %161 = vector.broadcast %160 : vector<1x32xf32> to vector<8x32xf32>
    %162 = arith.addf %159, %161 : vector<8x32xf32>
    %163 = arith.addf %3, %162 : vector<8x32xf32>
    %c0_70 = arith.constant 0 : index
    %c0_71 = arith.constant 0 : index
    %164 = vector.load %arg8[%c0_70, %c0_71] : memref<32x64xf32, #tpu.memory_space<vmem>>, vector<32x64xf32>
    %cst_72 = arith.constant dense<0.000000e+00> : vector<1x64xf32>
    %165 = tpu.matmul %11, %164, %cst_72 {dimension_numbers = #tpu.dot_dimension_numbers<[1], [0], [0], [1], [0, 0, 1, 1], [], []>} : vector<1x32xf32>, vector<32x64xf32>, vector<1x64xf32> -> vector<1x64xf32>
    %c0_73 = arith.constant 0 : index
    %c0_74 = arith.constant 0 : index
    %166 = vector.load %arg9[%c0_73, %c0_74] : memref<1x64xf32, #tpu.memory_space<vmem>>, vector<1x64xf32>
    %167 = arith.addf %165, %166 : vector<1x64xf32>
    %168 = vector.extract_strided_slice %167 {offsets = [0, 0], sizes = [1, 32], strides = [1, 1]} : vector<1x64xf32> to vector<1x32xf32>
    %169 = vector.extract_strided_slice %167 {offsets = [0, 32], sizes = [1, 32], strides = [1, 1]} : vector<1x64xf32> to vector<1x32xf32>
    %cst_75 = arith.constant dense<0.000000e+00> : vector<8xf32>
    %170 = vector.multi_reduction <add>, %163, %cst_75 [1] : vector<8x32xf32> to vector<8xf32>
    %171 = vector.shape_cast %170 : vector<8xf32> to vector<8x1xf32>
    %cst_76 = arith.constant 3.200000e+01 : f32
    %172 = vector.broadcast %cst_76 : f32 to vector<8x1xf32>
    %173 = arith.divf %171, %172 : vector<8x1xf32>
    %174 = vector.broadcast %173 : vector<8x1xf32> to vector<8x32xf32>
    %175 = arith.subf %163, %174 : vector<8x32xf32>
    %176 = arith.mulf %175, %175 : vector<8x32xf32>
    %cst_77 = arith.constant dense<0.000000e+00> : vector<8xf32>
    %177 = vector.multi_reduction <add>, %176, %cst_77 [1] : vector<8x32xf32> to vector<8xf32>
    %178 = vector.shape_cast %177 : vector<8xf32> to vector<8x1xf32>
    %cst_78 = arith.constant 3.200000e+01 : f32
    %179 = vector.broadcast %cst_78 : f32 to vector<8x1xf32>
    %180 = arith.divf %178, %179 : vector<8x1xf32>
    %181 = vector.broadcast %173 : vector<8x1xf32> to vector<8x32xf32>
    %182 = arith.subf %163, %181 : vector<8x32xf32>
    %cst_79 = arith.constant 9.99999997E-7 : f32
    %183 = vector.broadcast %cst_79 : f32 to vector<8x1xf32>
    %184 = arith.addf %180, %183 : vector<8x1xf32>
    %185 = math.rsqrt %184 : vector<8x1xf32>
    %186 = vector.broadcast %185 : vector<8x1xf32> to vector<8x32xf32>
    %187 = arith.mulf %182, %186 : vector<8x32xf32>
    %cst_80 = arith.constant 1.000000e+00 : f32
    %188 = vector.broadcast %cst_80 : f32 to vector<1x32xf32>
    %189 = arith.addf %188, %169 : vector<1x32xf32>
    %190 = vector.broadcast %189 : vector<1x32xf32> to vector<8x32xf32>
    %191 = arith.mulf %187, %190 : vector<8x32xf32>
    %192 = vector.broadcast %168 : vector<1x32xf32> to vector<8x32xf32>
    %193 = arith.addf %191, %192 : vector<8x32xf32>
    %c0_81 = arith.constant 0 : index
    %c0_82 = arith.constant 0 : index
    %194 = vector.load %arg16[%c0_81, %c0_82] : memref<32x128xf32, #tpu.memory_space<vmem>>, vector<32x128xf32>
    %cst_83 = arith.constant dense<0.000000e+00> : vector<8x128xf32>
    %195 = tpu.matmul %193, %194, %cst_83 {dimension_numbers = #tpu.dot_dimension_numbers<[1], [0], [0], [1], [0, 0, 1, 1], [], []>} : vector<8x32xf32>, vector<32x128xf32>, vector<8x128xf32> -> vector<8x128xf32>
    %c0_84 = arith.constant 0 : index
    %c0_85 = arith.constant 0 : index
    %196 = vector.load %arg17[%c0_84, %c0_85] : memref<1x128xf32, #tpu.memory_space<vmem>>, vector<1x128xf32>
    %197 = vector.broadcast %196 : vector<1x128xf32> to vector<8x128xf32>
    %198 = arith.addf %195, %197 : vector<8x128xf32>
    %cst_86 = arith.constant 0.000000e+00 : f32
    %199 = vector.broadcast %cst_86 : f32 to vector<8x128xf32>
    %200 = arith.maximumf %198, %199 : vector<8x128xf32>
    %201 = arith.mulf %200, %200 : vector<8x128xf32>
    %c0_87 = arith.constant 0 : index
    %c0_88 = arith.constant 0 : index
    %202 = vector.load %arg18[%c0_87, %c0_88] : memref<128x32xf32, #tpu.memory_space<vmem>>, vector<128x32xf32>
    %cst_89 = arith.constant dense<0.000000e+00> : vector<8x32xf32>
    %203 = tpu.matmul %201, %202, %cst_89 {dimension_numbers = #tpu.dot_dimension_numbers<[1], [0], [0], [1], [0, 0, 1, 1], [], []>} : vector<8x128xf32>, vector<128x32xf32>, vector<8x32xf32> -> vector<8x32xf32>
    %c0_90 = arith.constant 0 : index
    %c0_91 = arith.constant 0 : index
    %204 = vector.load %arg19[%c0_90, %c0_91] : memref<1x32xf32, #tpu.memory_space<vmem>>, vector<1x32xf32>
    %205 = vector.broadcast %204 : vector<1x32xf32> to vector<8x32xf32>
    %206 = arith.addf %203, %205 : vector<8x32xf32>
    %207 = arith.addf %163, %206 : vector<8x32xf32>
    %c0_92 = arith.constant 0 : index
    %c0_93 = arith.constant 0 : index
    %c0_94 = arith.constant 0 : index
    %208 = vector.load %arg20[%c0_92, %c0_93, %c0_94] : memref<1x8x32xf32, #tpu.memory_space<vmem>>, vector<1x8x32xf32>
    %209 = vector.shape_cast %208 : vector<1x8x32xf32> to vector<8x32xf32>
    %210 = vector.shape_cast %207 : vector<8x32xf32> to vector<1x8x32xf32>
    tpu.vector_store %arg20[%c0_92, %c0_93, %c0_94], %210 {strides = array<i32>} : memref<1x8x32xf32, #tpu.memory_space<vmem>>, vector<1x8x32xf32>,
    return
  }
  func.func @transform_0(%arg0: i32) -> (i32, i32, i32) {
    %c0_i32 = arith.constant 0 : i32
    %c0_i32_0 = arith.constant 0 : i32
    %c0_i32_1 = arith.constant 0 : i32
    return %arg0, %c0_i32, %c0_i32_0 : i32, i32, i32
  }
  func.func @transform_1(%arg0: i32) -> (i32, i32, i32) {
    %c0_i32 = arith.constant 0 : i32
    %c0_i32_0 = arith.constant 0 : i32
    %c0_i32_1 = arith.constant 0 : i32
    return %arg0, %c0_i32, %c0_i32_0 : i32, i32, i32
  }
  func.func @transform_2(%arg0: i32) -> (i32, i32, i32) {
    %c0_i32 = arith.constant 0 : i32
    %c0_i32_0 = arith.constant 0 : i32
    %c0_i32_1 = arith.constant 0 : i32
    return %arg0, %c0_i32, %c0_i32_0 : i32, i32, i32
  }
  func.func @transform_3(%arg0: i32) -> (i32, i32) {
    %c0_i32 = arith.constant 0 : i32
    %c0_i32_0 = arith.constant 0 : i32
    %c0_i32_1 = arith.constant 0 : i32
    return %c0_i32, %c0_i32_0 : i32, i32
  }
  func.func @transform_4(%arg0: i32) -> (i32, i32) {
    %c0_i32 = arith.constant 0 : i32
    %c0_i32_0 = arith.constant 0 : i32
    %c0_i32_1 = arith.constant 0 : i32
    return %c0_i32, %c0_i32_0 : i32, i32
  }
  func.func @transform_5(%arg0: i32) -> (i32, i32) {
    %c0_i32 = arith.constant 0 : i32
    %c0_i32_0 = arith.constant 0 : i32
    %c0_i32_1 = arith.constant 0 : i32
    return %c0_i32, %c0_i32_0 : i32, i32
  }
  func.func @transform_6(%arg0: i32) -> (i32, i32) {
    %c0_i32 = arith.constant 0 : i32
    %c0_i32_0 = arith.constant 0 : i32
    %c0_i32_1 = arith.constant 0 : i32
    return %c0_i32, %c0_i32_0 : i32, i32
  }
  func.func @transform_7(%arg0: i32) -> (i32, i32) {
    %c0_i32 = arith.constant 0 : i32
    %c0_i32_0 = arith.constant 0 : i32
    %c0_i32_1 = arith.constant 0 : i32
    return %c0_i32, %c0_i32_0 : i32, i32
  }
  func.func @transform_8(%arg0: i32) -> (i32, i32) {
    %c0_i32 = arith.constant 0 : i32
    %c0_i32_0 = arith.constant 0 : i32
    %c0_i32_1 = arith.constant 0 : i32
    return %c0_i32, %c0_i32_0 : i32, i32
  }
  func.func @transform_9(%arg0: i32) -> (i32, i32) {
    %c0_i32 = arith.constant 0 : i32
    %c0_i32_0 = arith.constant 0 : i32
    %c0_i32_1 = arith.constant 0 : i32
    return %c0_i32, %c0_i32_0 : i32, i32
  }
  func.func @transform_10(%arg0: i32) -> (i32, i32) {
    %c0_i32 = arith.constant 0 : i32
    %c0_i32_0 = arith.constant 0 : i32
    %c0_i32_1 = arith.constant 0 : i32
    return %c0_i32, %c0_i32_0 : i32, i32
  }
  func.func @transform_11(%arg0: i32) -> (i32, i32) {
    %c0_i32 = arith.constant 0 : i32
    %c0_i32_0 = arith.constant 0 : i32
    %c0_i32_1 = arith.constant 0 : i32
    return %c0_i32, %c0_i32_0 : i32, i32
  }
  func.func @transform_12(%arg0: i32) -> (i32, i32) {
    %c0_i32 = arith.constant 0 : i32
    %c0_i32_0 = arith.constant 0 : i32
    %c0_i32_1 = arith.constant 0 : i32
    return %c0_i32, %c0_i32_0 : i32, i32
  }
  func.func @transform_13(%arg0: i32) -> (i32, i32) {
    %c0_i32 = arith.constant 0 : i32
    %c0_i32_0 = arith.constant 0 : i32
    %c0_i32_1 = arith.constant 0 : i32
    return %c0_i32, %c0_i32_0 : i32, i32
  }
  func.func @transform_14(%arg0: i32) -> (i32, i32) {
    %c0_i32 = arith.constant 0 : i32
    %c0_i32_0 = arith.constant 0 : i32
    %c0_i32_1 = arith.constant 0 : i32
    return %c0_i32, %c0_i32_0 : i32, i32
  }
  func.func @transform_15(%arg0: i32) -> (i32, i32) {
    %c0_i32 = arith.constant 0 : i32
    %c0_i32_0 = arith.constant 0 : i32
    %c0_i32_1 = arith.constant 0 : i32
    return %c0_i32, %c0_i32_0 : i32, i32
  }
  func.func @transform_16(%arg0: i32) -> (i32, i32) {
    %c0_i32 = arith.constant 0 : i32
    %c0_i32_0 = arith.constant 0 : i32
    %c0_i32_1 = arith.constant 0 : i32
    return %c0_i32, %c0_i32_0 : i32, i32
  }
  func.func @transform_17(%arg0: i32) -> (i32, i32) {
    %c0_i32 = arith.constant 0 : i32
    %c0_i32_0 = arith.constant 0 : i32
    %c0_i32_1 = arith.constant 0 : i32
    return %c0_i32, %c0_i32_0 : i32, i32
  }
  func.func @transform_18(%arg0: i32) -> (i32, i32) {
    %c0_i32 = arith.constant 0 : i32
    %c0_i32_0 = arith.constant 0 : i32
    %c0_i32_1 = arith.constant 0 : i32
    return %c0_i32, %c0_i32_0 : i32, i32
  }
  func.func @transform_19(%arg0: i32) -> (i32, i32, i32) {
    %c0_i32 = arith.constant 0 : i32
    %c0_i32_0 = arith.constant 0 : i32
    %c0_i32_1 = arith.constant 0 : i32
    return %arg0, %c0_i32, %c0_i32_0 : i32, i32, i32
  }
}

</mosaic_0001>

<bundles_post_ra>
// kernel: perceiver_block_pallas.1
= control target key start
LH: loop header
LB: loop body
LE: loop exit
PB: predicated region body
PF: predicated region fallthrough
CT: control target
= control target key end

     0   :  { %s2214_s0 = inlined_call_operand.vmem [shape: f32[2,16,32], index: 0, kind: input, shape index: {}]   ;;  %s2215_s1 = inlined_call_operand.vmem [shape: f32[2,8,32], index: 1, kind: input, shape index: {}]   ;;  %s2216_s2 = inlined_call_operand.vmem [shape: f32[2,1,32], index: 2, kind: input, shape index: {}]   ;;  %s2217_s3 = inlined_call_operand.vmem [shape: f32[32,64], index: 3, kind: input, shape index: {}]   ;;  %s2218_s4 = inlined_call_operand.vmem [shape: f32[1,64], index: 4, kind: input, shape index: {}]   ;;  %s2219_s5 = inlined_call_operand.vmem [shape: f32[32,64], index: 5, kind: input, shape index: {}]   ;;  %s2220_s6 = inlined_call_operand.vmem [shape: f32[1,64], index: 6, kind: input, shape index: {}]   ;;  %s2221_s7 = inlined_call_operand.vmem [shape: f32[32,64], index: 7, kind: input, shape index: {}]   ;;  %s2222_s8 = inlined_call_operand.vmem [shape: f32[1,64], index: 8, kind: input, shape index: {}]   ;;  %s2223_s9 = inlined_call_operand.vmem [shape: f32[32,32], index: 9, kind: input, shape index: {}]   ;;  %s2224_s10 = inlined_call_operand.vmem [shape: f32[1,32], index: 10, kind: input, shape index: {}]   ;;  %s2225_s11 = inlined_call_operand.vmem [shape: f32[32,64], index: 11, kind: input, shape index: {}]   ;;  %s2226_s12 = inlined_call_operand.vmem [shape: f32[1,64], index: 12, kind: input, shape index: {}]   ;;  %s2227_s13 = inlined_call_operand.vmem [shape: f32[32,32], index: 13, kind: input, shape index: {}]   ;;  %s2228_s14 = inlined_call_operand.vmem [shape: f32[1,32], index: 14, kind: input, shape index: {}]   ;;  %s2229_s15 = inlined_call_operand.vmem [shape: f32[32,128], index: 15, kind: input, shape index: {}]   ;;  %s2230_s16 = inlined_call_operand.vmem [shape: f32[1,128], index: 16, kind: input, shape index: {}]   ;;  %s2231_s17 = inlined_call_operand.vmem [shape: f32[128,32], index: 17, kind: input, shape index: {}]   ;;  %s2232_s18 = inlined_call_operand.vmem [shape: f32[1,32], index: 18, kind: input, shape index: {}]   ;;  %s2233_s19 = inlined_call_operand.hbm [shape: f32[2,8,32], index: 19, kind: output, shape index: {}]  }
   0x1   :  { %2246 = sst [smem:[#allocation13_spill]] %s2214_s0 }
   0x2   :  { %2247 = sst [smem:[#allocation14_spill]] %s2215_s1 }
   0x3   :  { %2248 = sst [smem:[#allocation15_spill]] %s2216_s2 }
   0x4   :  { %2249 = sst [smem:[#allocation16_spill]] %s2217_s3 }
   0x5   :  { %2250 = sst [smem:[#allocation17_spill]] %s2230_s16 }
   0x6   :  { %2251 = sst [smem:[#allocation18_spill]] %s2232_s18 }
   0x7   :  { %2252 = sst [smem:[#allocation19_spill]] %s2233_s19 }
   0x8   :  { %24 = vsyncpa [#allocation3], 0 }
   0x9   :  { %26 = vsyncpa [#allocation3 + $0x1], 0  ;;  %s1838_s0 = smov 0   ;;  %s1840_s30 = smov 0  }
   0xa   :  { %s1842_s20 = smov 0   ;;  %s1844_s21 = smov 0  }
   0xb LB: > { %2253 = sst [smem:[#allocation5_spill]] %s1716_s0  ;;  %s1859_s1 = sadd.s32 4294967295, %s1728_s21   ;;  %s1728_s21 = sphi %s1844_s21, %s2275_s21   ;;  %s1724_s20 = sphi %s1842_s20, %s2277_s20   ;;  %s1720_s30 = sphi %s1840_s30, %s2279_s30   ;;  %s1716_s0 = sphi %s1838_s0, %s2278_s0  }
   0xc   : > { %2254 = sst [smem:[#allocation6_spill]] %s1724_s20  ;;  %s1519_s22 = sadd.s32 4294967294, %s1728_s21  }
   0xd   : > { %2255 = sst [smem:[#allocation7_spill]] %s1728_s21  ;;  %s1863_s2 = sadd.s32 1, %s1728_s21  }
   0xe   : > { %2256 = sst [smem:[#allocation8_spill]] %s1859_s1  ;;  %s453_s23 = sadd.s32 1, %s1724_s20 }
   0xf   : > { %2257 = sst [smem:[#allocation9_spill]] %s1863_s2  ;;  %s450_s24 = ssub.s32 %s1728_s21, %s1863_s2 }
  0x10   : > { %p463_p0 = scmp.ne.s32.totalorder %s1724_s20, %s1720_s30  ;;  %p451_p1 = scmp.eq.s32.totalorder %s450_s24, 0 }
  0x11   : > { %p464_p2 = scmp.eq.s32.totalorder %s1859_s1, 1  ;;  %p469_p3 = scmp.ne.s32.totalorder %s1720_s30, %s1716_s0 }
  0x12   : > { %p470_p4 = scmp.eq.s32.totalorder %s1519_s22, 1  ;;  %p1522_p7 = scmp.ge.s32.totalorder %s1728_s21, 1 }
  0x13   : > { %s1874_s25 = scalar_select %p451_p1, %s1724_s20, %s453_s23  }
  0x14   : > { %p1876_p5 = por %p464_p2, %p463_p0  ;;  %p1880_p6 = por %p470_p4, %p469_p3 }
  0x15   : > { %2258 = sst [smem:[#allocation10_spill]] %s1874_s25  ;;  %p557_p8 = scmp.lt.s32.totalorder %s1728_s21, 3 }
  0x16   : > { %s2259_s3 = scalar_select %p1876_p5, 1, 0 }
  0x17   : > { %s2261_s26 = scalar_select %p1880_p6, 1, 0 }
  0x18   : > { %2260 = sst [smem:[#allocation11_spill]] %s2259_s3  ;;  %p558_p9 = pnand %p1522_p7, %p557_p8 }
  0x19   : > { %2262 = sst [smem:[#allocation12_spill]] %s2261_s26  ;;  %p620_p10 = scmp.lt.s32.totalorder (!%p558_p9), %s1859_s1, 1 }
  0x1a   : > { %561 = sbr.rel (%p558_p9) target bundleno = 2190 (0x88e), region = 96  ;;  %s2263_s29 = sld [smem:[#allocation16_spill]] (!%p558_p9) }
  0x1b   : > { %s2264_s0 = sld [smem:[#allocation14_spill]] (!%p558_p9)  ;;  %s1731_s3 = smov (!%p558_p9), 96  }
  0x1c   : > { %s2265_s27 = sld [smem:[#allocation13_spill]] (!%p558_p9)  ;;  %s1733_s2 = smov (!%p558_p9), 112  }
  0x1d   : > { %s2266_s24 = sld [smem:[#allocation15_spill]] (!%p558_p9)  ;;  %s1736_s23 = smov (!%p558_p9), 80  }
  0x1e   : > { %s2267_s19 = sld [smem:[#allocation8_spill]] (!%p558_p9) }
  0x1f   : > { %v725_v1 = vld [vmem:[%s2219_s5 + $0x18] sm:$0xff]  ;;  %v724_v3 = vld [vmem:[%s2219_s5 + $0x10] sm:$0xff]  ;;  %s621_s26 = scalar_select %p620_p10, %s1859_s1, 1  ;;  %vm660_vm0 = vcmask 261120   ;;  %v723_v5 = vld [vmem:[%s2219_s5 + $0x8] sm:$0xff]  ;;  %v1730_v30 = vmov 32.0  }
  0x20   : > { %v658_v0 = vld [vmem:[%s2263_s29 + $0x18] sm:$0xff]  ;;  %v657_v2 = vld [vmem:[%s2263_s29 + $0x10] sm:$0xff]  ;;  %739 = vmatpush.msra.mxu1 %v725_v1  ;;  %v656_v4 = vld [vmem:[%s2263_s29 + $0x8] sm:$0xff]  ;;  %vm874_vm15 = vcmask 64512   ;;  %s2269_s16 = sld [smem:[#allocation18_spill]] }
  0x21   : > { %676 = vmatpush.msra.mxu0 %v658_v0  ;;  %s1526_s25 = sshll.u32 %s621_s26, 3  ;;  %s1563_s22 = sshll.u32 %s621_s26, 4  ;;  %v655_v6 = vld [vmem:[%s2263_s29] sm:$0xff]  ;;  %v805_v0 = vld [vmem:[%s2223_s9 + $0x18] sm:$0xff] }
  0x22   : > { %740 = vmatpush.msra.mxu1 %v724_v3  ;;  %v722_v7 = vld [vmem:[%s2219_s5] sm:$0xff]  ;;  %s628_s21 = scalar_lea.vmem %s2264_s0, %s1526_s25  ;;  %s624_s28 = scalar_lea.vmem %s2265_s27, %s1563_s22  ;;  %v836_v1 = vld [vmem:[%s2225_s11 + $0x18] sm:$0xff] }
  0x23   : > { %677 = vmatpush.msra.mxu0 %v657_v2  ;;  %v1918_v8 = vld [vmem:[%s628_s21] sm:$0xff]  ;;  %v633_v9 = vld [vmem:[%s624_s28 + $0x8] sm:$0xff]  ;;  %s631_s29 = scalar_lea.vmem %s2266_s24, %s621_s26  ;;  %v804_v2 = vld [vmem:[%s2223_s9 + $0x10] sm:$0xff]  ;;  %859 = vmatpush.msra.mxu3 %v836_v1  ;;  %s1732_s25 = smov 120  }
  0x24   : > { %741 = vmatpush.msra.mxu1 %v723_v5  ;;  %v684_v10 = vsel %vm660_vm0, %v1918_v8, 0.0  ;;  %v750_v11 = vsel %vm660_vm0, %v633_v9, 0.0  ;;  %v635_v12 = vld [vmem:[%s631_s29] sm:$0x1]  ;;  %s1734_s0 = smov 104   ;;  %s1737_s24 = smov 72  }
  0x25   : > { %678 = vmatpush.msra.mxu0 %v656_v4  ;;  %685 = vadd.xlane.f32.xlu0 %v684_v10  ;;  %v636_v13 = vsub.f32 0.0, %v635_v12  ;;  %v632_v14 = vld [vmem:[%s624_s28] sm:$0xff]  ;;  %v835_v4 = vld [vmem:[%s2225_s11 + $0x10] sm:$0xff]  ;;  %s1735_s28 = smov 88   ;;  %s617_s21 = sand.u32 1, %s1720_s30  }
  0x26   : > { %742 = vmatpush.msra.mxu1 %v722_v7  ;;  %751 = vadd.xlane.f32.xlu1 %v750_v11  ;;  %v747_v16 = vsel %vm660_vm0, %v632_v14, 0.0  ;;  %v659_v52 = vld [vmem:[%s2218_s4] sm:$0x1]  ;;  %v803_v7 = vld [vmem:[%s2223_s9 + $0x8] sm:$0xff]  ;;  %s1523_s27 = sshll.u32 %s617_s21, 3  ;;  %s2270_s26 = sld [smem:[#allocation19_spill]] }
  0x27   : > { %679 = vmatpush.msra.mxu0 %v655_v6  ;;  %v637_v15 = vmul.f32 1.442695, %v636_v13  ;;  %v726_v53 = vld [vmem:[%s2220_s6] sm:$0x1]  ;;  %860 = vmatpush.msra.mxu3 %v835_v4 }
  0x28   : > { %v802_v11 = vld [vmem:[%s2223_s9] sm:$0xff] }
  0x29   : > { %1636 = vpow2.f32 %v637_v15  ;;  %825 = vmatpush.msrb.mxu0 %v805_v0 }
  0x2b   : > { %826 = vmatpush.msrb.mxu0 %v804_v2 }
  0x2d   : > { %748 = vadd.xlane.f32.xlu0 %v747_v16  ;;  %827 = vmatpush.msrb.mxu0 %v803_v7 }
  0x2f   : > { %v1637_v17 = vpop.eup %1636  ;;  %828 = vmatpush.msrb.mxu0 %v802_v11 }
  0x30   : > { %v639_v18 = vadd.f32 1.0, %v1637_v17 }
  0x32   : > { %1638 = vrcp.f32 %v639_v18  ;;  %v651_v21 = vand.u32 2147483648, %v639_v18  ;;  %vm645_vm1 = vweird.f32 %v639_v18  ;;  %v649_v23 = vand.u32 2147483647, %v639_v18 }
  0x33   : > { %1640 = vrcp.f32 %v1730_v30 }
  0x34   : > { %v652_v25 = vor.u32 1.1754944e-38, %v651_v21  ;;  %vm650_vm4 = vcmp.eq.f32.partialorder %v649_v23, 8.507059e+37 }
  0x38   : > { %v1639_v19 = vpop.eup %1638 }
  0x39   : > { %v641_v20 = vmul.f32 %v1639_v19, %v639_v18  ;;  %vm646_vm2 = vweird.f32 %v1639_v19  ;;  %v1641_v31 = vpop.eup %1640 }
  0x3a   : > { %vm647_vm3 = vmor %vm645_vm1, %vm646_vm2  ;;  %v688_v32 = vmul.f32 32.0, %v1641_v31  ;;  %vm692_vm5 = vweird.f32 %v1641_v31  ;;  %vm907_vm1 = vcmask 195584  }
  0x3b   : > { %v642_v22 = vsub.f32 1.0, %v641_v20 }
  0x3c   : > { %v689_v33 = vsub.f32 1.0, %v688_v32 }
  0x3d   : > { %v643_v24 = vmul.f32 %v1639_v19, %v642_v22 }
  0x3e   : > { %v690_v34 = vmul.f32 %v1641_v31, %v689_v33 }
  0x3f   : > { %v644_v26 = vadd.f32 %v1639_v19, %v643_v24 }
  0x40   : > { %v691_v35 = vadd.f32 %v1641_v31, %v690_v34 }
  0x41   : > { %v648_v27 = vsel %vm647_vm3, %v1639_v19, %v644_v26 }
  0x42   : > { %v653_v28 = vsel %vm650_vm4, %v652_v25, %v648_v27  ;;  %v1933_v36 = vsel %vm692_vm5, %v1641_v31, %v691_v35 }
  0x43   : > { %v1927_v29 = vmul.f32 %v653_v28, %v635_v12  ;;  %v833_v12 = vld [vmem:[%s2225_s11] sm:$0xff] }
  0x45   : > { %1527 = vmatmul.msk.f32.vlgmr.msra.gmra.mxu0 %vm660_vm0, %v1927_v29  ;;  %1528 = vmatmul.msk.f32.vlgmr.msra.gmra.mxu1 %vm660_vm0, %v1927_v29 }
  0x98   : > { %v686_v37 = vpop.xlane.xlu0 %685 }
  0x99   : > { %v694_v38 = vmul.f32 %v1933_v36, %v686_v37  ;;  %v752_v41 = vpop.xlane.xlu1 %751 }
  0x9a   : > { %v754_v45 = vmul.f32 %v752_v41, %v1933_v36 }
  0x9b   : > { %v1937_v39 = vsub.f32 %v1918_v8, %v694_v38 }
  0x9c   : > { %v1946_v47 = vsub.f32 %v633_v9, %v754_v45  ;;  %v834_v9 = vld [vmem:[%s2225_s11 + $0x8] sm:$0xff] }
  0x9d   : > { %v696_v40 = vmul.f32 %v1937_v39, %v1937_v39  ;;  %861 = vmatpush.msra.mxu3 %v834_v9 }
  0x9e   : > { %v758_v50 = vmul.f32 %v1946_v47, %v1946_v47 }
  0x9f   : > { %v697_v42 = vsel %vm660_vm0, %v696_v40, 0.0  ;;  %862 = vmatpush.msra.mxu3 %v833_v12 }
  0xa0   : > { %698 = vadd.xlane.f32.xlu1 %v697_v42  ;;  %v749_v43 = vpop.xlane.xlu0 %748  ;;  %v762_v51 = vsel %vm660_vm0, %v758_v50, 0.0 }
  0xa1   : > { %v753_v44 = vmul.f32 %v749_v43, %v1933_v36 }
  0xa3   : > { %v1944_v46 = vsub.f32 %v632_v14, %v753_v44 }
  0xa5   : > { %v757_v48 = vmul.f32 %v1944_v46, %v1944_v46 }
  0xa7   : > { %v759_v49 = vsel %vm660_vm0, %v757_v48, 0.0 }
  0xa8   : > { %760 = vadd.xlane.f32.xlu2 %v759_v49 }
  0xb0   : > { %763 = vadd.xlane.f32.xlu2 %v762_v51 }
  0xc2   : > { %v681_v54 = vpop.f32.mrf.mxu0  ;;  %v744_v55 = vpop.f32.mrf.mxu1 }
  0xc3   : > { %v1960_v56 = vadd.f32 %v681_v54, %v659_v52  ;;  %v1962_v57 = vadd.f32 %v744_v55, %v726_v53 }
  0xc5   : > { %v713_v58 = vadd.f32 1.0, %v1960_v56  ;;  %v791_v59 = vadd.f32 1.0, %v1962_v57  ;;  %v720_v38 = vperm.slane %v1960_v56, 0  ;;  %v799_v49 = vperm.slane %v1962_v57, 0 }
  0xc7   : > { %v714_v60 = vperm.slane %v713_v58, 0  ;;  %v792_v61 = vperm.slane %v791_v59, 0  ;;  %v1631_v59 = vld [vmem:[%s2224_s10] ss:$0 sm:$0xff] }
  0xc9   : > { %794 = vrot.lane.b32.xlu1 %v792_v61, %s1731_s3  ;;  %716 = vrot.lane.b32.xlu0 %v714_v60, %s1731_s3 }
 0x113   : > { %v699_v62 = vpop.xlane.xlu1 %698 }
 0x114   : > { %v700_v63 = vmul.f32 %v699_v62, %v1933_v36 }
 0x116   : > { %v701_v3 = vadd.f32 1e-06, %v700_v63 }
 0x118   : > { %1642 = vrsqrt.f32 %v701_v3  ;;  %vm708_vm6 = vweird.f32 %v701_v3 }
 0x11b   : > { %v761_v5 = vpop.xlane.xlu2 %760 }
 0x11c   : > { %v765_v6 = vmul.f32 %v761_v5, %v1933_v36 }
 0x11e   : > { %v767_v10 = vadd.f32 1e-06, %v765_v6  ;;  %v1643_v13 = vpop.eup %1642 }
 0x11f   : > { %v703_v14 = vmul.f32 %v1643_v13, %v701_v3  ;;  %vm709_vm7 = vweird.f32 %v1643_v13 }
 0x120   : > { %1644 = vrsqrt.f32 %v767_v10  ;;  %vm710_vm8 = vmor %vm708_vm6, %vm709_vm7  ;;  %vm775_vm9 = vweird.f32 %v767_v10 }
 0x121   : > { %v704_v19 = vmul.f32 %v1643_v13, %v703_v14 }
 0x123   : > { %v764_v15 = vpop.xlane.xlu2 %763  ;;  %v705_v21 = vmul.f32 0.5, %v704_v19 }
 0x124   : > { %v766_v16 = vmul.f32 %v764_v15, %v1933_v36  ;;  %v951_v15 = vld [vmem:[%s2227_s13] sm:$0xff] }
 0x125   : > { %v706_v24 = vsub.f32 1.5, %v705_v21  ;;  %1073 = vmatpush.msra.mxu2 %v951_v15 }
 0x126   : > { %v1645_v17 = vpop.eup %1644  ;;  %v768_v18 = vadd.f32 1e-06, %v766_v16 }
 0x127   : > { %v770_v20 = vmul.f32 %v1645_v17, %v767_v10  ;;  %v707_v28 = vmul.f32 %v1643_v13, %v706_v24  ;;  %vm776_vm10 = vweird.f32 %v1645_v17 }
 0x128   : > { %1646 = vrsqrt.f32 %v768_v18  ;;  %vm777_vm11 = vmor %vm775_vm9, %vm776_vm10  ;;  %vm785_vm12 = vweird.f32 %v768_v18 }
 0x129   : > { %v771_v22 = vmul.f32 %v1645_v17, %v770_v20  ;;  %v711_v32 = vsel %vm710_vm8, %v1643_v13, %v707_v28 }
 0x12a   : > { %v712_v34 = vmul.f32 %v711_v32, %v1937_v39 }
 0x12b   : > { %v772_v26 = vmul.f32 0.5, %v771_v22 }
 0x12d   : > { %v773_v30 = vsub.f32 1.5, %v772_v26 }
 0x12e   : > { %v1647_v23 = vpop.eup %1646 }
 0x12f   : > { %v780_v25 = vmul.f32 %v1647_v23, %v768_v18  ;;  %v774_v33 = vmul.f32 %v1645_v17, %v773_v30  ;;  %vm786_vm13 = vweird.f32 %v1647_v23 }
 0x130   : > { %vm787_vm14 = vmor %vm785_vm12, %vm786_vm13 }
 0x131   : > { %v781_v27 = vmul.f32 %v1647_v23, %v780_v25  ;;  %v778_v41 = vsel %vm777_vm11, %v1645_v17, %v774_v33 }
 0x132   : > { %v789_v45 = vmul.f32 %v778_v41, %v1944_v46  ;;  %v1632_v46 = vld [vmem:[%s2226_s12] ss:$0 sm:$0xff] }
 0x133   : > { %v782_v31 = vmul.f32 0.5, %v781_v27 }
 0x135   : > { %v783_v35 = vsub.f32 1.5, %v782_v31 }
 0x137   : > { %v784_v44 = vmul.f32 %v1647_v23, %v783_v35 }
 0x139   : > { %v788_v39 = vsel %vm787_vm14, %v1647_v23, %v784_v44 }
 0x13a   : > { %v790_v50 = vmul.f32 %v788_v39, %v1946_v47 }
 0x13b   : > { %v717_v37 = vpop.permute.xlu0 %716  ;;  %v795_v43 = vpop.permute.xlu1 %794 }
 0x13c   : > { %v719_v40 = vmul.f32 %v717_v37, %v712_v34  ;;  %v797_v48 = vmul.f32 %v795_v43, %v789_v45  ;;  %v798_v52 = vmul.f32 %v795_v43, %v790_v50 }
 0x13e   : > { %v721_v42 = vadd.f32 %v720_v38, %v719_v40  ;;  %v800_v51 = vadd.f32 %v799_v49, %v797_v48  ;;  %v801_v53 = vadd.f32 %v799_v49, %v798_v52 }
 0x140   : > { %1529 = vmatmul.msk.f32.vlgmr.msrb.gmra.mxu0 %vm660_vm0, %v721_v42  ;;  %1530 = vmatmul.msk.f32.vlgmr.msra.gmra.mxu3 %vm660_vm0, %v721_v42 }
 0x148   : > { %1531 = vmatmul.msk.f32.gmra.mxu3 %vm660_vm0, %v800_v51 }
 0x150   : > { %1532 = vmatmul.msk.f32.gmra.mxu3 %vm660_vm0, %v801_v53 }
 0x1bd   : > { %v830_v60 = vpop.f32.mrf.mxu0 }
 0x1be   : > { %v831_v61 = vadd.f32 %v1631_v59, %v830_v60 }
 0x1c0   : > { %v873_v62 = vmul.f32 0.35355338, %v831_v61 }
 0x1c3   : > { %v864_v54 = vpop.f32.mrf.mxu3 }
 0x1c4   : > { %v2007_v55 = vadd.f32 %v1632_v46, %v864_v54 }
 0x1c6   : > { %919 = vrot.lane.b32.xlu0 %v2007_v55, %s1731_s3 }
 0x1cb   : > { %v867_v56 = vpop.f32.mrf.mxu3 }
 0x1cc   : > { %v868_v57 = vadd.f32 %v1632_v46, %v867_v56 }
 0x1ce   : > { %956 = vrot.lane.b32.xlu0 %v868_v57, %s1732_s25 }
 0x1d3   : > { %v870_v47 = vpop.f32.mrf.mxu3 }
 0x1d4   : > { %v871_v58 = vadd.f32 %v1632_v46, %v870_v47 }
 0x1d6   : > { %958 = vrot.lane.b32.xlu1 %v871_v58, %s1732_s25  ;;  %1533 = vmatpush.xpose.msk.msra.mxu0 %vm874_vm15, %v871_v58  ;;  %v2034_v14 = vpack.i.bf16 %v868_v57, %v871_v58 }
 0x1d7   : > { %1084 = vrot.lane.b32.xlu0 %v871_v58, %s1733_s2 }
 0x1da   : > { %1534 = vmatpush.xpose.msk.msra.mxu0 %vm874_vm15, %v868_v57 }
 0x1de   : > { %954 = vrot.lane.b32.xlu1 %v2007_v55, %s1732_s25  ;;  %1535 = vmatpush.xpose.msk.msra.mxu0 %vm874_vm15, %v2007_v55 }
 0x1df   : > { %1080 = vrot.lane.b32.xlu0 %v2007_v55, %s1733_s2 }
 0x1e1   : > { %1536 = vmatmul.msk.f32.vlgmr.msra.gmra.mxu0 %vm874_vm15, %v873_v62 }
 0x1e6   : > { %1082 = vrot.lane.b32.xlu1 %v868_v57, %s1733_s2 }
 0x1e7   : > { %1186 = vrot.lane.b32.xlu0 %v868_v57, %s1734_s0 }
 0x1ee   : > { %1078 = vrot.lane.b32.xlu1 %v873_v62, %s1733_s2 }
 0x1f6   : > { %1182 = vrot.lane.b32.xlu1 %v873_v62, %s1734_s0 }
 0x238   : > { %v920_v63 = vpop.permute.xlu0 %919 }
 0x240   : > { %v957_v0 = vpop.permute.xlu0 %956 }
 0x248   : > { %v959_v1 = vpop.permute.xlu1 %958 }
 0x249   : > { %1538 = vmatpush.xpose.msk.msrb.mxu3 %vm874_vm15, %v959_v1  ;;  %v1085_v3 = vpop.permute.xlu0 %1084 }
 0x24d   : > { %1539 = vmatpush.xpose.msk.msrb.mxu3 %vm874_vm15, %v957_v0 }
 0x250   : > { %v955_v2 = vpop.permute.xlu1 %954 }
 0x251   : > { %1540 = vmatpush.xpose.msk.msrb.mxu3 %vm874_vm15, %v955_v2  ;;  %v1081_v5 = vpop.permute.xlu0 %1080 }
 0x255   : > { %1545 = vmatpush.xpose.msk.msra.mxu3 %vm874_vm15, %v1085_v3 }
 0x258   : > { %v1083_v4 = vpop.permute.xlu1 %1082 }
 0x259   : > { %1546 = vmatpush.xpose.msk.msra.mxu3 %vm874_vm15, %v1083_v4  ;;  %v1187_v25 = vpop.permute.xlu0 %1186 }
 0x25d   : > { %1547 = vmatpush.xpose.msk.msra.mxu3 %vm874_vm15, %v1081_v5 }
 0x25e   : > { %v904_v6 = vpop.f32.mrf.mxu0 }
 0x25f   : > { %v908_v7 = vsel %vm907_vm1, %v904_v6, -inf }
 0x260   : > { %909 = vmax.xlane.f32.xlu2 %v908_v7  ;;  %v1079_v23 = vpop.permute.xlu1 %1078  ;;  %v1031_v7 = vld [vmem:[%s2227_s13 + $0x8] sm:$0xff] }
 0x261   : > { %1050 = vmatpush.msrb.mxu0 %v1031_v7  ;;  %v1384_v7 = vld [vmem:[%s2231_s17 + $0x18] sm:$0xff] }
 0x268   : > { %v1183_v30 = vpop.permute.xlu1 %1182 }
 0x2d3   : > { %v910_v9 = vpop.xlane.xlu2 %909 }
 0x2d4   : > { %v911_v10 = vsub.f32 %v904_v6, %v910_v9 }
 0x2d6   : > { %v912_v11 = vmul.f32 1.442695, %v911_v10  ;;  %v1157_v10 = vld [vmem:[%s2227_s13 + $0x10] sm:$0xff] }
 0x2d7   : > { %1176 = vmatpush.msra.mxu0 %v1157_v10  ;;  %v1382_v10 = vld [vmem:[%s2231_s17 + $0x8] sm:$0xff] }
 0x2d8   : > { %1648 = vpow2.f32 %v912_v11  ;;  %v1261_v11 = vld [vmem:[%s2227_s13 + $0x18] sm:$0xff] }
 0x2de   : > { %v1649_v12 = vpop.eup %1648 }
 0x2df   : > { %v914_v13 = vsel %vm907_vm1, %v1649_v12, 0.0 }
 0x2e0   : > { %915 = vadd.xlane.f32.xlu2 %v914_v13 }
 0x2f8   : > { %1612 = vrot.lane.b32.xlu2 %v2034_v14, %s1731_s3 }
 0x300   : > { %952 = vrot.lane.b32.xlu2 %v873_v62, %s1732_s25  ;;  %s619_s25 = scalar_lea.vmem [#allocation2], %s1523_s27  ;;  %s1686_s27 = scalar_lea.hbm %s2270_s26, 16 }
 0x301   : > { %s1436_s22 = sshll.u32 %s619_s25, 4  ;;  %s1437_s22 = int_to_ptr.vmem [resolvable:$true] %s1436_s22 }
 0x308   : > { %1188 = vrot.lane.b32.xlu2 %v871_v58, %s1734_s0 }
 0x310   : > { %1184 = vrot.lane.b32.xlu2 %v2007_v55, %s1734_s0  ;;  %s2268_s0 = sld [smem:[#allocation17_spill]] }
 0x353   : > { %v916_v16 = vpop.xlane.xlu2 %915 }
 0x354   : > { %1650 = vrcp.f32 %v916_v16 }
 0x35a   : > { %v1651_v19 = vpop.eup %1650 }
 0x35b   : > { %v1613_v17 = vpop.permute.xlu2 %1612  ;;  %v918_v21 = vmul.f32 %v1651_v19, %v1649_v12  ;;  %v1293_v19 = vld [vmem:[%s2221_s7 + $0x8] sm:$0xff] }
 0x35c   : > { %v1614_v18 = vunpack.i.l.bf16 %v1613_v17  ;;  %v1615_v20 = vunpack.i.h.bf16 %v1613_v17  ;;  %v1295_v17 = vld [vmem:[%s2221_s7 + $0x18] sm:$0xff] }
 0x35e   : > { %944 = vmatpush.msrb.mxu1 %v1614_v18  ;;  %v1294_v18 = vld [vmem:[%s2221_s7 + $0x10] sm:$0xff] }
 0x360   : > { %945 = vmatpush.msrb.mxu1 %v1615_v20  ;;  %v1292_v20 = vld [vmem:[%s2221_s7] sm:$0xff] }
 0x362   : > { %946 = vmatpush.msrb.mxu1 %v920_v63 }
 0x363   : > { %v953_v22 = vpop.permute.xlu2 %952  ;;  %1537 = vmatmul.msk.f32.vlgmr.msrb.gmra.mxu1 %vm907_vm1, %v918_v21 }
 0x364   : > { %1541 = vmatmul.msk.f32.vlgmr.msrb.gmra.mxu3 %vm874_vm15, %v953_v22 }
 0x365   : > { %1280 = vmatpush.msrb.mxu3 %v1261_v11  ;;  %v1381_v11 = vld [vmem:[%s2231_s17] sm:$0xff] }
 0x36b   : > { %v1189_v24 = vpop.permute.xlu2 %1188 }
 0x36c   : > { %1548 = vmatmul.msk.f32.vlgmr.msra.gmra.mxu3 %vm874_vm15, %v1079_v23  ;;  %1551 = vmatpush.xpose.msk.msrb.mxu2 %vm874_vm15, %v1189_v24 }
 0x370   : > { %1552 = vmatpush.xpose.msk.msrb.mxu2 %vm874_vm15, %v1187_v25  ;;  %v1633_v25 = vld [vmem:[%s2228_s14] ss:$0 sm:$0xff] }
 0x373   : > { %v1185_v26 = vpop.permute.xlu2 %1184 }
 0x374   : > { %1553 = vmatpush.xpose.msk.msrb.mxu2 %vm874_vm15, %v1185_v26 }
 0x3e0   : > { %v948_v27 = vpop.f32.mrf.mxu1 }
 0x3e1   : > { %1544 = vmatmul.msk.f32.vlgmr.msra.gmra.mxu2 %vm874_vm15, %v948_v27 }
 0x3e7   : > { %v985_v28 = vpop.f32.mrf.mxu3 }
 0x3e8   : > { %v988_v31 = vsel %vm907_vm1, %v985_v28, -inf }
 0x3e9   : > { %989 = vmax.xlane.f32.xlu0 %v988_v31  ;;  %1554 = vmatmul.msk.f32.vlgmr.msrb.gmra.mxu2 %vm874_vm15, %v1183_v30 }
 0x3ef   : > { %v1111_v32 = vpop.f32.mrf.mxu3 }
 0x3f0   : > { %v1114_v33 = vsel %vm907_vm1, %v1111_v32, -inf }
 0x3f1   : > { %1115 = vmax.xlane.f32.xlu2 %v1114_v33 }
 0x409   : > { %1617 = vrot.lane.b32.xlu2 %v2034_v14, %s1735_s28 }
 0x45c   : > { %v990_v34 = vpop.xlane.xlu0 %989 }
 0x45d   : > { %v991_v35 = vsub.f32 %v985_v28, %v990_v34 }
 0x45f   : > { %v992_v37 = vmul.f32 1.442695, %v991_v35 }
 0x461   : > { %1652 = vpow2.f32 %v992_v37 }
 0x464   : > { %v1116_v38 = vpop.xlane.xlu2 %1115  ;;  %v2056_v40 = vpop.f32.mrf.mxu2 }
 0x465   : > { %v1117_v41 = vsub.f32 %v1111_v32, %v1116_v38 }
 0x467   : > { %v1653_v42 = vpop.eup %1652  ;;  %v1118_v43 = vmul.f32 1.442695, %v1117_v41 }
 0x468   : > { %v994_v44 = vsel %vm907_vm1, %v1653_v42, 0.0 }
 0x469   : > { %995 = vadd.xlane.f32.xlu0 %v994_v44  ;;  %1654 = vpow2.f32 %v1118_v43  ;;  %v1350_v43 = vld [vmem:[%s2229_s15 + $0x10] sm:$0xff]  ;;  %v1349_v44 = vld [vmem:[%s2229_s15 + $0x8] sm:$0xff] }
 0x46c   : > { %v1618_v45 = vpop.permute.xlu2 %1617  ;;  %v1215_v48 = vpop.f32.mrf.mxu2 }
 0x46d   : > { %v1619_v39 = vunpack.i.l.bf16 %v1618_v45  ;;  %v1218_v49 = vsel %vm907_vm1, %v1215_v48, -inf  ;;  %v1620_v50 = vunpack.i.h.bf16 %v1618_v45  ;;  %v1348_v45 = vld [vmem:[%s2229_s15] sm:$0xff] }
 0x46e   : > { %1219 = vmax.xlane.f32.xlu1 %v1218_v49  ;;  %v1394_v49 = vld [vmem:[%s2231_s17 + $0x68] sm:$0xff] }
 0x46f   : > { %1024 = vmatpush.msra.mxu1 %v1619_v39  ;;  %v1655_v51 = vpop.eup %1654  ;;  %v1395_v39 = vld [vmem:[%s2231_s17 + $0x70] sm:$0xff] }
 0x470   : > { %v1120_v52 = vsel %vm907_vm1, %v1655_v51, 0.0 }
 0x471   : > { %1025 = vmatpush.msra.mxu1 %v1620_v50 }
 0x476   : > { %1121 = vadd.xlane.f32.xlu1 %v1120_v52  ;;  %v1393_v52 = vld [vmem:[%s2231_s17 + $0x60] sm:$0xff] }
 0x47d   : > { %999 = vrot.lane.b32.xlu0 %v2007_v55, %s1735_s28  ;;  %s1560_s28 = sshll.u32 %s2267_s19, 3  ;;  %s1424_s19 = scalar_lea.sflag [#allocation3], %s617_s21 }
 0x485   : > { %1125 = vrot.lane.b32.xlu0 %v2007_v55, %s1736_s23 }
 0x48d   : > { %1627 = vrot.lane.b32.xlu0 %v2034_v14, %s1737_s24 }
 0x48f   : > { %1622 = vrot.lane.b32.xlu1 %v2034_v14, %s1736_s23 }
 0x497   : > { %1229 = vrot.lane.b32.xlu1 %v2007_v55, %s1737_s24 }
 0x4dc   : > { %v996_v46 = vpop.xlane.xlu0 %995 }
 0x4dd   : > { %1656 = vrcp.f32 %v996_v46  ;;  %v1392_v46 = vld [vmem:[%s2231_s17 + $0x58] sm:$0xff] }
 0x4e1   : > { %v1220_v53 = vpop.xlane.xlu1 %1219 }
 0x4e2   : > { %v1221_v54 = vsub.f32 %v1215_v48, %v1220_v53  ;;  %v1396_v48 = vld [vmem:[%s2231_s17 + $0x78] sm:$0xff] }
 0x4e3   : > { %v1657_v57 = vpop.eup %1656  ;;  %1401 = vmatpush.msra.mxu2 %v1396_v48 }
 0x4e4   : > { %v1222_v56 = vmul.f32 1.442695, %v1221_v54  ;;  %v998_v59 = vmul.f32 %v1657_v57, %v1653_v42  ;;  %v1351_v42 = vld [vmem:[%s2229_s15 + $0x18] sm:$0xff]  ;;  %v1391_v54 = vld [vmem:[%s2231_s17 + $0x50] sm:$0xff] }
 0x4e5   : > { %1402 = vmatpush.msra.mxu2 %v1395_v39 }
 0x4e6   : > { %1658 = vpow2.f32 %v1222_v56  ;;  %v1389_v56 = vld [vmem:[%s2231_s17 + $0x40] sm:$0xff] }
 0x4e7   : > { %1403 = vmatpush.msra.mxu2 %v1394_v49 }
 0x4e9   : > { %v1122_v61 = vpop.xlane.xlu1 %1121  ;;  %1404 = vmatpush.msra.mxu2 %v1393_v52 }
 0x4ea   : > { %1660 = vrcp.f32 %v1122_v61  ;;  %v1386_v61 = vld [vmem:[%s2231_s17 + $0x28] sm:$0xff] }
 0x4eb   : > { %1405 = vmatpush.msra.mxu2 %v1392_v46 }
 0x4ec   : > { %v1659_v47 = vpop.eup %1658 }
 0x4ed   : > { %v1224_v58 = vsel %vm907_vm1, %v1659_v47, 0.0  ;;  %1406 = vmatpush.msra.mxu2 %v1391_v54 }
 0x4ee   : > { %1225 = vadd.xlane.f32.xlu2 %v1224_v58 }
 0x4ef   : > { %v1000_v60 = vpop.permute.xlu0 %999 }
 0x4f0   : > { %1026 = vmatpush.msra.mxu1 %v1000_v60  ;;  %v1661_v0 = vpop.eup %1660 }
 0x4f1   : > { %1542 = vmatmul.msk.f32.vlgmr.msra.gmra.mxu1 %vm907_vm1, %v998_v59  ;;  %v1124_v3 = vmul.f32 %v1661_v0, %v1655_v51  ;;  %v1387_v59 = vld [vmem:[%s2231_s17 + $0x30] sm:$0xff] }
 0x4f7   : > { %v1126_v62 = vpop.permute.xlu0 %1125 }
 0x4ff   : > { %v1628_v2 = vpop.permute.xlu0 %1627 }
 0x500   : > { %v1629_v4 = vunpack.i.l.bf16 %v1628_v2  ;;  %v1630_v5 = vunpack.i.h.bf16 %v1628_v2 }
 0x501   : > { %v1623_v55 = vpop.permute.xlu1 %1622 }
 0x502   : > { %v1624_v63 = vunpack.i.l.bf16 %v1623_v55  ;;  %v1625_v1 = vunpack.i.h.bf16 %v1623_v55  ;;  %v1385_v55 = vld [vmem:[%s2231_s17 + $0x20] sm:$0xff] }
 0x504   : > { %1150 = vmatpush.msrb.mxu1 %v1624_v63 }
 0x506   : > { %1151 = vmatpush.msrb.mxu1 %v1625_v1 }
 0x508   : > { %1152 = vmatpush.msrb.mxu1 %v1126_v62 }
 0x509   : > { %1549 = vmatmul.msk.f32.vlgmr.msrb.gmra.mxu1 %vm907_vm1, %v1124_v3  ;;  %v1230_v6 = vpop.permute.xlu1 %1229 }
 0x50a   : > { %1254 = vmatpush.msra.mxu1 %v1629_v4 }
 0x50c   : > { %1255 = vmatpush.msra.mxu1 %v1630_v5 }
 0x50e   : > { %1256 = vmatpush.msra.mxu1 %v1230_v6 }
 0x510   : > { %1371 = vmatpush.msrb.mxu1 %v1351_v42 }
 0x512   : > { %1372 = vmatpush.msrb.mxu1 %v1350_v43 }
 0x514   : > { %1373 = vmatpush.msrb.mxu1 %v1349_v44 }
 0x516   : > { %1374 = vmatpush.msrb.mxu1 %v1348_v45 }
 0x561   : > { %v1226_v9 = vpop.xlane.xlu2 %1225 }
 0x562   : > { %1662 = vrcp.f32 %v1226_v9  ;;  %v1383_v9 = vld [vmem:[%s2231_s17 + $0x10] sm:$0xff] }
 0x568   : > { %v1663_v12 = vpop.eup %1662 }
 0x569   : > { %v1228_v13 = vmul.f32 %v1663_v12, %v1659_v47  ;;  %v1388_v47 = vld [vmem:[%s2231_s17 + $0x38] sm:$0xff]  ;;  %v1634_v12 = vld [vmem:[%s2268_s0] ss:$0 sm:$0xff] }
 0x56b   : > { %1555 = vmatmul.msk.f32.vlgmr.msra.gmra.mxu1 %vm907_vm1, %v1228_v13 }
 0x56e   : > { %v1028_v14 = vpop.f32.mrf.mxu1 }
 0x56f   : > { %1543 = vmatmul.msk.f32.vlgmr.msrb.gmra.mxu0 %vm874_vm15, %v1028_v14 }
 0x570   : > { %1309 = vmatpush.msrb.mxu0 %v1295_v17  ;;  %v1635_v17 = vld [vmem:[%s2269_s16] ss:$0 sm:$0xff] }
 0x572   : > { %1310 = vmatpush.msrb.mxu0 %v1294_v18 }
 0x574   : > { %1311 = vmatpush.msrb.mxu0 %v1293_v19 }
 0x576   : > { %1312 = vmatpush.msrb.mxu0 %v1292_v20 }
 0x586   : > { %v1154_v15 = vpop.f32.mrf.mxu1 }
 0x587   : > { %1550 = vmatmul.msk.f32.vlgmr.msra.gmra.mxu0 %vm874_vm15, %v1154_v15 }
 0x58f   : > { %1557 = vmatmul.msk.f32.vlgmr.msrb.gmra.mxu0 %vm660_vm0, %v1927_v29  ;;  %v1296_v29 = vld [vmem:[%s2222_s8] sm:$0x1] }
 0x5e8   : > { %v1258_v16 = vpop.f32.mrf.mxu1 }
 0x5e9   : > { %1556 = vmatmul.msk.f32.vlgmr.msrb.gmra.mxu3 %vm874_vm15, %v1258_v16 }
 0x5ec   : > { %v1052_v21 = vpop.f32.mrf.mxu0 }
 0x5ed   : > { %v1076_v23 = vadd.f32 %v2056_v40, %v1052_v21 }
 0x604   : > { %v1178_v22 = vpop.f32.mrf.mxu0 }
 0x605   : > { %v1181_v24 = vadd.f32 %v1178_v22, %v1076_v23 }
 0x60c   : > { %v1314_v32 = vpop.f32.mrf.mxu0 }
 0x60d   : > { %v1315_v33 = vadd.f32 %v1314_v32, %v1296_v29 }
 0x60f   : > { %v1339_v34 = vadd.f32 1.0, %v1315_v33  ;;  %v1346_v4 = vperm.slane %v1315_v33, 0 }
 0x611   : > { %v1340_v35 = vperm.slane %v1339_v34, 0 }
 0x613   : > { %1342 = vrot.lane.b32.xlu2 %v1340_v35, %s1731_s3  ;;  %s1434_s3 = scalar_lea.hbm %s2270_s26, %s1560_s28 }
 0x614   : > { %s1438_s20 = sshll.u32 %s1434_s3, 4  ;;  %s1439_s20 = int_to_ptr.hbm [resolvable:$true] %s1438_s20 }
 0x615   : > { %s1680_s2 = sshra.s32 %s1439_s20, 4  ;;  %s1681_s2 = int_to_ptr.hbm [resolvable:$true] %s1680_s2 }
 0x616   : > { %s1682_s0 = scalar_lea.hbm %s1681_s2, 8  ;;  %p1687_p0 = scmp.lt.s32.totalorder %s1681_s2, %s2270_s26 }
 0x617   : > { %p1683_p11 = scmp.ne.s32.totalorder %s1681_s2, %s1682_s0  ;;  %p1688_p1 = scmp.lt.s32.totalorder %s1686_s27, %s1682_s0 }
 0x619   : > { %p1684_p12 = pnand %p1683_p11, %p1876_p5  ;;  %p1689_p2 = por %p1688_p1, %p1687_p0 }
 0x61b   : > { %p1685_p13 = pneg %p1684_p12 }
 0x61d   : > { %p1690_p3 = pnand %p1689_p2, %p1685_p13 }
 0x66c   : > { %v1282_v26 = vpop.f32.mrf.mxu3 }
 0x66d   : > { %v1285_v27 = vadd.f32 %v1282_v26, %v1181_v24  ;;  %v1343_v1 = vpop.permute.xlu2 %1342 }
 0x66f   : > { %v1290_v28 = vadd.f32 %v1633_v25, %v1285_v27 }
 0x671   : > { %v2101_v30 = vadd.f32 %v1290_v28, %v1918_v8 }
 0x673   : > { %v1317_v31 = vsel %vm660_vm0, %v2101_v30, 0.0 }
 0x674   : > { %1318 = vadd.xlane.f32.xlu0 %v1317_v31 }
 0x6e7   : > { %v1319_v37 = vpop.xlane.xlu0 %1318 }
 0x6e8   : > { %v1320_v38 = vmul.f32 %v1319_v37, %v1933_v36 }
 0x6ea   : > { %v1321_v8 = vsub.f32 %v2101_v30, %v1320_v38 }
 0x6ec   : > { %v1322_v40 = vmul.f32 %v1321_v8, %v1321_v8 }
 0x6ee   : > { %v1323_v41 = vsel %vm660_vm0, %v1322_v40, 0.0 }
 0x6ef   : > { %1324 = vadd.xlane.f32.xlu1 %v1323_v41 }
 0x762   : > { %v1325_v50 = vpop.xlane.xlu1 %1324 }
 0x763   : > { %v1326_v51 = vmul.f32 %v1325_v50, %v1933_v36  ;;  %v1390_v36 = vld [vmem:[%s2231_s17 + $0x48] sm:$0xff] }
 0x764   : > { %1407 = vmatpush.msra.mxu2 %v1390_v36 }
 0x765   : > { %v1327_v53 = vadd.f32 1e-06, %v1326_v51 }
 0x766   : > { %1408 = vmatpush.msra.mxu2 %v1389_v56 }
 0x767   : > { %1664 = vrsqrt.f32 %v1327_v53  ;;  %vm1334_vm3 = vweird.f32 %v1327_v53 }
 0x768   : > { %1409 = vmatpush.msra.mxu2 %v1388_v47 }
 0x76a   : > { %1410 = vmatpush.msra.mxu2 %v1387_v59 }
 0x76c   : > { %1411 = vmatpush.msra.mxu2 %v1386_v61 }
 0x76d   : > { %v1665_v57 = vpop.eup %1664 }
 0x76e   : > { %v1329_v58 = vmul.f32 %v1665_v57, %v1327_v53  ;;  %vm1335_vm2 = vweird.f32 %v1665_v57  ;;  %1412 = vmatpush.msra.mxu2 %v1385_v55 }
 0x76f   : > { %vm1336_vm4 = vmor %vm1334_vm3, %vm1335_vm2 }
 0x770   : > { %v1330_v60 = vmul.f32 %v1665_v57, %v1329_v58  ;;  %1413 = vmatpush.msra.mxu2 %v1384_v7 }
 0x772   : > { %v1331_v62 = vmul.f32 0.5, %v1330_v60  ;;  %1414 = vmatpush.msra.mxu2 %v1383_v9 }
 0x774   : > { %v1332_v63 = vsub.f32 1.5, %v1331_v62  ;;  %1415 = vmatpush.msra.mxu2 %v1382_v10 }
 0x776   : > { %v1333_v0 = vmul.f32 %v1665_v57, %v1332_v63  ;;  %1416 = vmatpush.msra.mxu2 %v1381_v11 }
 0x778   : > { %v1337_v2 = vsel %vm1336_vm4, %v1665_v57, %v1333_v0 }
 0x779   : > { %v1338_v3 = vmul.f32 %v1337_v2, %v1321_v8 }
 0x77b   : > { %v1345_v5 = vmul.f32 %v1343_v1, %v1338_v3 }
 0x77d   : > { %v1347_v6 = vadd.f32 %v1346_v4, %v1345_v5 }
 0x77f   : > { %1558 = vmatmul.msk.f32.vlgmr.msrb.gmra.mxu1 %vm660_vm0, %v1347_v6 }
 0x7fc   : > { %v1376_v13 = vpop.f32.mrf.mxu1 }
 0x7fd   : > { %v1377_v14 = vadd.f32 %v1634_v12, %v1376_v13 }
 0x7ff   : > { %v1379_v15 = vmax.f32 %v1377_v14, 0.0 }
 0x801   : > { %v1380_v16 = vmul.f32 %v1379_v15, %v1379_v15 }
 0x803   : > { %1417 = vmatmul.f32.vlgmr.msra.gmra.mxu2 %v1380_v16 }
 0x886   : > { %v1418_v18 = vpop.f32.mrf.mxu2 }
 0x887   : > { %v1419_v19 = vadd.f32 %v1635_v17, %v1418_v18 }
 0x889   : > { %v1421_v20 = vadd.f32 %v1419_v19, %v2101_v30 }
 0x88b   : > { %1422 = vst.msk [vmem:[%s619_s25] sm:$0xff] %vm660_vm0, %v1421_v20 }
 0x88c   : > { %1693 = shalt.err (!%p1690_p3)
}
 0x88d   : > { %1564 = dma.vmem_to_hbm [thread:$0]  (%p1876_p5), %s1437_s22, 128, %s1439_s20, %s1424_s19  }
 0x88e PF: > { %s2272_s21 = sld [smem:[#allocation7_spill]] }
 0x88f   : > { %s2273_s18 = sld [smem:[#allocation5_spill]] }
 0x894   : > { %p1570_p4 = scmp.ge.s32.totalorder %s2272_s21, 2 }
 0x895   : > { %s1450_s3 = sand.u32 1, %s2273_s18  }
 0x896   : > { %p1567_p7 = pnand %p1570_p4, %p1880_p6  ;;  %s1451_s25 = scalar_lea.sflag [#allocation3], %s1450_s3 }
 0x898   : > { %p1568_p8 = pneg %p1567_p7 }
 0x89a   : > { %1711 = dma.done.wait (%p1568_p8), %s1451_s25, 128  }
 0x89b   : > { %1713 = vsyncadd (%p1568_p8), %s1451_s25, 4294967168  ;;  %s2275_s21 = sld [smem:[#allocation9_spill]]  ;;  %s2278_s0 = smov %s1720_s30 }
 0x89c   : > { %s2276_s2 = sld [smem:[#allocation6_spill]] }
 0x89d   : > { %s2277_s20 = sld [smem:[#allocation10_spill]] }
 0x8a1   : > { %p29_p9 = scmp.ge.s32.totalorder %s2275_s21, 4  }
 0x8a2   : > { %s2279_s30 = smov %s2276_s2 }
 0x8a3   :  { %31 = sbr.rel (!%p29_p9) target bundleno = 11 (0xb), region = 137 }
 0x8a8   :  { %1457 = vsyncpa [#allocation3], 1 }
 0x8a9   :  { %1459 = vsyncpa [#allocation3 + $0x1], 1 }

</bundles_post_ra>
